<compile_context>
chip_gen: v6e
topology: v6e:2x2x1
jax: 0.10.0
libtpu: 0.0.40
codegen_flags: <defaults>
</compile_context>

<pallas_src>
import functools

import jax
import jax.numpy as jnp
from jax.experimental import pallas as pl
from jax.experimental.pallas import tpu as pltpu

HIDDEN = 768
EPS = 1e-12


def _round_up(x, m):
    return ((x + m - 1) // m) * m


def _self_output_kernel(th_ref, x_ref, w_ref, params_ref, res_ref, o_ref):
    # Dense: x @ W^T + b.  W^T is pre-transposed/cast to bf16 once in the
    # wrapper; bf16 x bf16 -> native MXU path with f32 accumulation.  When the
    # activations are already bf16 the astype is an identity (no VPU pass).
    x = x_ref[...].astype(w_ref.dtype)
    y = jnp.dot(x, w_ref[...], preferred_element_type=jnp.float32)

    bias = params_ref[0:1, :]    # (1, H) f32
    gamma = params_ref[1:2, :]   # (1, H) f32
    beta = params_ref[2:3, :]    # (1, H) f32
    y = y + bias

    # TODO(synk): dropout(p=0.1) is identity in eval mode; training-mode RNG
    # dropout is intentionally not applied here.

    # Residual add + LayerNorm over the hidden (lane) axis, f32 epilogue.
    # One-pass statistics: var = E[z^2] - mean^2, clamped >= 0 to avoid NaN
    # from catastrophic cancellation in f32.
    z = y + res_ref[...].astype(jnp.float32)
    inv_h = 1.0 / HIDDEN
    s = jnp.sum(z, axis=-1, keepdims=True)
    ss = jnp.sum(z * z, axis=-1, keepdims=True)
    mean = s * inv_h
    var = jnp.maximum(ss * inv_h - mean * mean, 0.0)
    norm = (z - mean) * jax.lax.rsqrt(var + EPS)
    out = norm * gamma + beta

    # activation_sparse: zero out values with |v| <= Th (runtime SMEM scalar).
    th = th_ref[0]
    out = jnp.where(jnp.abs(out) > th, out, 0.0)

    # Ragged edge rows (when M % br != 0) may hold garbage here; they are
    # masked on writeback by Pallas, so nothing invalid reaches HBM.
    o_ref[...] = out.astype(o_ref.dtype)


def prepare_self_output_params(weight, bias, gamma, beta):
    """One-time parameter prep (do this OUTSIDE the per-call path).

    weight: PyTorch layout [out_features, in_features] -> returned as
    W^T [H_in, H_out] cast to bf16 (mandatory: the f32 multi-pass MXU path
    would make the kernel compute-bound on v5e).  bias/gamma/beta are fused
    into a single (3, H) f32 array (rows: bias, gamma, beta)."""
    wt = jnp.asarray(weight).T.astype(jnp.bfloat16)
    params = jnp.stack([
        jnp.asarray(bias), jnp.asarray(gamma), jnp.asarray(beta)
    ]).astype(jnp.float32)
    return wt, params


def _choose_block_rows(m, requested):
    """Sanitize the row tile: multiple of 8, <= problem size, and >= 2 grid
    steps whenever possible so v7x's two TensorCores both get work."""
    if m <= 8:
        return m  # block equal to the full array dim is always legal
    br = max(8, _round_up(min(requested, m), 8))
    half = -(-m // 2)
    half = _round_up(half, 256) if half > 128 else _round_up(half, 8)
    return min(br, half)


@functools.partial(jax.jit, static_argnames=("block_rows",))
def sparse_bert_self_output(hidden_states, input_tensor, wt, params, th, *,
                            block_rows=512):
    """hidden_states, input_tensor: [B, S, H] (bf16 recommended, any float ok);
    wt: [H_in, H_out] bf16 (prepared); params: [3, H] f32 (bias, gamma, beta);
    th: scalar threshold (runtime value, no recompile on change)."""
    B, S, H = hidden_states.shape
    assert H == HIDDEN and wt.shape == (H, H) and params.shape == (3, H)
    M = B * S

    br = _choose_block_rows(M, block_rows)
    grid = (pl.cdiv(M, br),)

    x2d = hidden_states.reshape(M, H)
    res2d = input_tensor.reshape(M, H)
    th_arr = jnp.asarray(th, dtype=jnp.float32).reshape((1,))

    out2d = pl.pallas_call(
        _self_output_kernel,
        out_shape=jax.ShapeDtypeStruct((M, H), hidden_states.dtype),
        grid_spec=pltpu.PrefetchScalarGridSpec(
            num_scalar_prefetch=1,
            grid=grid,
            in_specs=[
                pl.BlockSpec((br, H), lambda i, th_s: (i, 0)),   # x
                pl.BlockSpec((H, H), lambda i, th_s: (0, 0)),    # W^T (resident)
                pl.BlockSpec((3, H), lambda i, th_s: (0, 0)),    # bias/gamma/beta
                pl.BlockSpec((br, H), lambda i, th_s: (i, 0)),   # residual
            ],
            out_specs=pl.BlockSpec((br, H), lambda i, th_s: (i, 0)),
        ),
        compiler_params=pltpu.CompilerParams(
            dimension_semantics=("parallel",)),
    )(th_arr, x2d, wt, params, res2d)

    return out2d.reshape(B, S, H)


def _reference(hidden_states, input_tensor, weight, bias, gamma, beta, th,
               mm_dtype=jnp.bfloat16):
    """Pure-JAX reference mirroring the kernel's bf16-matmul / f32-acc path."""
    x = hidden_states.astype(mm_dtype)
    w = jnp.asarray(weight).astype(mm_dtype)
    y = jnp.einsum("bsh,oh->bso", x, w,
                   preferred_element_type=jnp.float32) + bias
    z = y + input_tensor.astype(jnp.float32)
    mean = jnp.mean(z, axis=-1, keepdims=True)
    centered = z - mean
    var = jnp.mean(centered * centered, axis=-1, keepdims=True)
    norm = centered * jax.lax.rsqrt(var + EPS)
    affine = norm * gamma + beta
    out = affine * (jnp.abs(affine) > th)
    return out, affine


if __name__ == "__main__":
    key = jax.random.PRNGKey(0)
    k_x, k_r, k_w, k_b, k_g, k_be = jax.random.split(key, 6)

    B, S, H = 2, 8, HIDDEN
    Th = 0.1

    # bf16 activation I/O exercises the recommended (HBM-bandwidth-halving)
    # path; the kernel accepts f32 activations just as well.
    hidden_states = jax.random.normal(k_x, (B, S, H)).astype(jnp.bfloat16)
    input_tensor = jax.random.normal(k_r, (B, S, H)).astype(jnp.bfloat16)

    # Deterministic "Linear(768, 768)" + "LayerNorm(768)" parameters.
    weight = jax.random.normal(k_w, (H, H), dtype=jnp.float32) * 0.02
    bias = jax.random.normal(k_b, (H,), dtype=jnp.float32) * 0.02
    gamma = 1.0 + 0.01 * jax.random.normal(k_g, (H,), dtype=jnp.float32)
    beta = 0.01 * jax.random.normal(k_be, (H,), dtype=jnp.float32)

    # One-time parameter prep (transpose + bf16 cast + bias/gamma/beta fuse).
    wt, params = prepare_self_output_params(weight, bias, gamma, beta)

    out = sparse_bert_self_output(hidden_states, input_tensor, wt, params, Th)
    out = jax.block_until_ready(out)
    assert out.shape == (B, S, H)
    assert out.dtype == hidden_states.dtype

    ref, ref_affine = _reference(hidden_states, input_tensor, weight, bias,
                                 gamma, beta, Th)
    out_f32 = out.astype(jnp.float32)
    ref_f32 = ref.astype(jnp.float32)
    # Tolerance-check (bf16 output rounding + accumulation-order jitter).
    # Values whose magnitude sits right at the sparsity threshold may flip the
    # mask under tiny numeric differences, so exclude a narrow band around
    # |v| == Th from the elementwise comparison.
    close = jnp.abs(out_f32 - ref_f32) <= (2e-2 + 2e-2 * jnp.abs(ref_f32))
    near_th = jnp.abs(jnp.abs(ref_affine) - Th) < 5e-3
    assert bool(jnp.all(close | near_th))

    print("KERNEL_OK")
</pallas_src>

<mosaic_0001>
module attributes {stable_mosaic.version = 11 : i64} {
  func.func @_self_output_kernel(%arg0: i32, %arg1: memref<1xf32, #tpu.memory_space<smem>>, %arg2: memref<8x768xbf16, #tpu.memory_space<vmem>>, %arg3: memref<768x768xbf16, #tpu.memory_space<vmem>>, %arg4: memref<3x768xf32, #tpu.memory_space<vmem>>, %arg5: memref<8x768xbf16, #tpu.memory_space<vmem>>, %arg6: memref<8x768xbf16, #tpu.memory_space<vmem>>) attributes {dimension_semantics = [#tpu.dimension_semantics<parallel>], iteration_bounds = array<i64: 2>, scalar_prefetch = 1 : i64, scratch_operands = 0 : i64, tpu.core_type = #tpu.core_type<tc>, window_params = [{transform_indices = @transform_0, window_bounds = array<i64: 8, 768>}, {pipeline_mode = #tpu.pipeline_mode<synchronous>, transform_indices = @transform_1, window_bounds = array<i64: 768, 768>}, {pipeline_mode = #tpu.pipeline_mode<synchronous>, transform_indices = @transform_2, window_bounds = array<i64: 3, 768>}, {transform_indices = @transform_3, window_bounds = array<i64: 8, 768>}, {transform_indices = @transform_4, window_bounds = array<i64: 8, 768>}]} {
    %c0 = arith.constant 0 : index
    %c0_0 = arith.constant 0 : index
    %0 = vector.load %arg2[%c0, %c0_0] : memref<8x768xbf16, #tpu.memory_space<vmem>>, vector<8x768xbf16>
    %c0_1 = arith.constant 0 : index
    %c0_2 = arith.constant 0 : index
    %1 = vector.load %arg3[%c0_1, %c0_2] : memref<768x768xbf16, #tpu.memory_space<vmem>>, vector<768x768xbf16>
    %cst = arith.constant dense<0.000000e+00> : vector<8x768xf32>
    %2 = tpu.matmul %0, %1, %cst {dimension_numbers = #tpu.dot_dimension_numbers<[1], [0], [0], [1], [0, 0, 1, 1], [], []>} : vector<8x768xbf16>, vector<768x768xbf16>, vector<8x768xf32> -> vector<8x768xf32>
    %c0_3 = arith.constant 0 : index
    %c0_4 = arith.constant 0 : index
    %3 = vector.load %arg4[%c0_3, %c0_4] : memref<3x768xf32, #tpu.memory_space<vmem>>, vector<1x768xf32>
    %c1 = arith.constant 1 : index
    %c0_5 = arith.constant 0 : index
    %4 = vector.load %arg4[%c1, %c0_5] : memref<3x768xf32, #tpu.memory_space<vmem>>, vector<1x768xf32>
    %c2 = arith.constant 2 : index
    %c0_6 = arith.constant 0 : index
    %5 = vector.load %arg4[%c2, %c0_6] : memref<3x768xf32, #tpu.memory_space<vmem>>, vector<1x768xf32>
    %6 = vector.broadcast %3 : vector<1x768xf32> to vector<8x768xf32>
    %7 = arith.addf %2, %6 : vector<8x768xf32>
    %c0_7 = arith.constant 0 : index
    %c0_8 = arith.constant 0 : index
    %8 = vector.load %arg5[%c0_7, %c0_8] : memref<8x768xbf16, #tpu.memory_space<vmem>>, vector<8x768xbf16>
    %9 = arith.extf %8 : vector<8x768xbf16> to vector<8x768xf32>
    %10 = arith.addf %7, %9 : vector<8x768xf32>
    %cst_9 = arith.constant dense<0.000000e+00> : vector<8xf32>
    %11 = vector.multi_reduction <add>, %10, %cst_9 [1] : vector<8x768xf32> to vector<8xf32>
    %12 = vector.shape_cast %11 : vector<8xf32> to vector<8x1xf32>
    %13 = arith.mulf %10, %10 : vector<8x768xf32>
    %cst_10 = arith.constant dense<0.000000e+00> : vector<8xf32>
    %14 = vector.multi_reduction <add>, %13, %cst_10 [1] : vector<8x768xf32> to vector<8xf32>
    %15 = vector.shape_cast %14 : vector<8xf32> to vector<8x1xf32>
    %cst_11 = arith.constant 0.00130208337 : f32
    %16 = vector.broadcast %cst_11 : f32 to vector<8x1xf32>
    %17 = arith.mulf %12, %16 : vector<8x1xf32>
    %cst_12 = arith.constant 0.00130208337 : f32
    %18 = vector.broadcast %cst_12 : f32 to vector<8x1xf32>
    %19 = arith.mulf %15, %18 : vector<8x1xf32>
    %20 = arith.mulf %17, %17 : vector<8x1xf32>
    %21 = arith.subf %19, %20 : vector<8x1xf32>
    %cst_13 = arith.constant 0.000000e+00 : f32
    %22 = vector.broadcast %cst_13 : f32 to vector<8x1xf32>
    %23 = arith.maximumf %21, %22 : vector<8x1xf32>
    %24 = vector.broadcast %17 : vector<8x1xf32> to vector<8x768xf32>
    %25 = arith.subf %10, %24 : vector<8x768xf32>
    %cst_14 = arith.constant 9.99999996E-13 : f32
    %26 = vector.broadcast %cst_14 : f32 to vector<8x1xf32>
    %27 = arith.addf %23, %26 : vector<8x1xf32>
    %28 = math.rsqrt %27 : vector<8x1xf32>
    %29 = vector.broadcast %28 : vector<8x1xf32> to vector<8x768xf32>
    %30 = arith.mulf %25, %29 : vector<8x768xf32>
    %31 = vector.broadcast %4 : vector<1x768xf32> to vector<8x768xf32>
    %32 = arith.mulf %30, %31 : vector<8x768xf32>
    %33 = vector.broadcast %5 : vector<1x768xf32> to vector<8x768xf32>
    %34 = arith.addf %32, %33 : vector<8x768xf32>
    %c0_15 = arith.constant 0 : index
    %35 = memref.load %arg1[%c0_15] : memref<1xf32, #tpu.memory_space<smem>>
    %36 = math.absf %34 : vector<8x768xf32>
    %37 = vector.broadcast %35 : f32 to vector<8x768xf32>
    %38 = arith.cmpf ogt, %36, %37 : vector<8x768xf32>
    %cst_16 = arith.constant 0.000000e+00 : f32
    %39 = vector.broadcast %cst_16 : f32 to vector<8x768xf32>
    %40 = arith.select %38, %34, %39 : vector<8x768xi1>, vector<8x768xf32>
    %41 = arith.truncf %40 : vector<8x768xf32> to vector<8x768xbf16>
    %c0_17 = arith.constant 0 : index
    %c0_18 = arith.constant 0 : index
    %42 = vector.load %arg6[%c0_17, %c0_18] : memref<8x768xbf16, #tpu.memory_space<vmem>>, vector<8x768xbf16>
    tpu.vector_store %arg6[%c0_17, %c0_18], %41 {strides = array<i32>} : memref<8x768xbf16, #tpu.memory_space<vmem>>, vector<8x768xbf16>,
    return
  }
  func.func @transform_0(%arg0: i32, %arg1: memref<1xf32, #tpu.memory_space<smem>>) -> (i32, i32) {
    %c0_i32 = arith.constant 0 : i32
    %c0_i32_0 = arith.constant 0 : i32
    return %arg0, %c0_i32 : i32, i32
  }
  func.func @transform_1(%arg0: i32, %arg1: memref<1xf32, #tpu.memory_space<smem>>) -> (i32, i32) {
    %c0_i32 = arith.constant 0 : i32
    %c0_i32_0 = arith.constant 0 : i32
    %c0_i32_1 = arith.constant 0 : i32
    return %c0_i32, %c0_i32_0 : i32, i32
  }
  func.func @transform_2(%arg0: i32, %arg1: memref<1xf32, #tpu.memory_space<smem>>) -> (i32, i32) {
    %c0_i32 = arith.constant 0 : i32
    %c0_i32_0 = arith.constant 0 : i32
    %c0_i32_1 = arith.constant 0 : i32
    return %c0_i32, %c0_i32_0 : i32, i32
  }
  func.func @transform_3(%arg0: i32, %arg1: memref<1xf32, #tpu.memory_space<smem>>) -> (i32, i32) {
    %c0_i32 = arith.constant 0 : i32
    %c0_i32_0 = arith.constant 0 : i32
    return %arg0, %c0_i32 : i32, i32
  }
  func.func @transform_4(%arg0: i32, %arg1: memref<1xf32, #tpu.memory_space<smem>>) -> (i32, i32) {
    %c0_i32 = arith.constant 0 : i32
    %c0_i32_0 = arith.constant 0 : i32
    return %arg0, %c0_i32 : i32, i32
  }
}

</mosaic_0001>

<bundles_post_ra>
// kernel: sparse_bert_self_output.1
= control target key start
LH: loop header
LB: loop body
LE: loop exit
PB: predicated region body
PF: predicated region fallthrough
CT: control target
= control target key end

     0   :  { %s4140_s0 = inlined_call_operand.<no memory space> [shape: f32[1], index: 0, kind: input, shape index: {}]   ;;  %s4141_s1 = inlined_call_operand.hbm [shape: bf16[16,768], index: 1, kind: input, shape index: {}]   ;;  %s4142_s2 = inlined_call_operand.hbm [shape: bf16[768,768], index: 2, kind: input, shape index: {}]   ;;  %s4143_s3 = inlined_call_operand.hbm [shape: f32[3,768], index: 3, kind: input, shape index: {}]   ;;  %s4144_s4 = inlined_call_operand.hbm [shape: bf16[16,768], index: 4, kind: input, shape index: {}]   ;;  %s4145_s5 = inlined_call_operand.hbm [shape: bf16[16,768], index: 5, kind: output, shape index: {}]  }
   0x1   :  { %10 = sst [smem:[#allocation3]] %s4140_s0 }
   0x2   :  { %11 = vsyncpa [#allocation5], 0 }
   0x3   :  { %13 = vsyncpa [#allocation5 + $0x1], 0 }
   0x4   :  { %14 = vsyncpa [#allocation8], 0 }
   0x5   :  { %15 = vsyncpa [#allocation11], 0 }
   0x6   :  { %17 = vsyncpa [#allocation11 + $0x1], 0 }
   0x7   :  { %18 = vsyncpa [#allocation6], 0 }
   0x8   :  { %20 = vsyncpa [#allocation6 + $0x1], 0  ;;  %s3795_s20 = smov 0   ;;  %s3797_s21 = smov 0  }
   0x9   :  { %s3799_s22 = smov 0   ;;  %s3801_s23 = smov 0  }
   0xa LB: > { %s3816_s0 = sadd.s32 4294967295, %s3753_s23   ;;  %s2740_s24 = sadd.s32 4294967294, %s3753_s23   ;;  %s3753_s23 = sphi %s3801_s23, %s4169_s23   ;;  %s3749_s22 = sphi %s3799_s22, %s4168_s22   ;;  %s3745_s21 = sphi %s3797_s21, %s4167_s21   ;;  %s3741_s20 = sphi %s3795_s20, %s4166_s20  }
   0xb   : > { %p46_p0 = scmp.ne.s32.totalorder %s3745_s21, %s3741_s20  ;;  %p4146_p1 = scmp.eq.s32.totalorder %s3816_s0, 0 }
   0xc   : > { %p144_p3 = scmp.eq.s32.totalorder %s2740_s24, 1  ;;  %p2741_p5 = scmp.ge.s32.totalorder %s3753_s23, 1 }
   0xd   : > { %p3825_p4 = por %p4146_p1, %p46_p0  ;;  %p151_p7 = scmp.lt.s32.totalorder %s3753_s23, 3 }
   0xe   : > { %p3830_p6 = por %p144_p3, %p46_p0  ;;  %s3755_s28 = smov [#allocation7]  }
   0xf   : > { %s4151_s25 = scalar_select %p3825_p4, 1, 0 }
  0x10   : > { %s4152_s26 = scalar_select %p3830_p6, 1, 0 }
  0x11   : > { %p3835_p8 = pnand %p2741_p5, %p151_p7  ;;  %s163_s29 = sshll.u32 %s3755_s28, 4  ;;  %s164_s29 = int_to_ptr.vmem [resolvable:$true] %s163_s29 }
  0x12   : > { %s3756_s6 = smov [#allocation9]   ;;  %s3584_s8 = scalar_lea.vmem %s164_s29, 36864 }
  0x13   : > { %s4153_s27 = scalar_select %p3835_p8, 1, 0 }
  0x14   : > { %p3073_p9 = pneg %p3835_p8  ;;  %s177_s7 = sshll.u32 %s3756_s6, 4  ;;  %s178_s7 = int_to_ptr.vmem [resolvable:$true] %s177_s7 }
  0x15   : > { %p3585_p13 = scmp.ne.s32.totalorder %s164_s29, %s3584_s8  ;;  %p3592_p5 = scmp.lt.s32.totalorder %s164_s29, %s164_s29 }
  0x16   : > { %p3844_p11 = pnand %p3073_p9, %p4146_p1  ;;  %p3593_p7 = scmp.lt.s32.totalorder %s3584_s8, %s3584_s8 }
  0x18   : > { %p3575_p12 = pneg %p3844_p11  ;;  %p3594_p10 = por %p3593_p7, %p3592_p5 }
  0x1a   : > { %p3587_p0 = pnand %p3585_p13, %p3575_p12 }
  0x1c   : > { %p3588_p3 = pneg %p3587_p0 }
  0x1e   : > { %p3595_p9 = pnand %p3594_p10, %p3588_p3 }
  0x20   : > { %3598 = shalt.err (!%p3595_p9)
}
  0x21   : > { %s3757_s9 = smov 384   ;;  %s3758_s10 = smov 24  }
  0x22   : > { %3076 = dma.hbm_to_vmem [thread:$0]  (!%p3844_p11), %s4142_s2, 36864, %s164_s29, [#allocation8], %s3757_s9, %s3757_s9, %s3758_s10  }
  0x23   : > { %s3610_s13 = scalar_lea.vmem %s178_s7, 384  ;;  %p3618_p2 = scmp.lt.s32.totalorder %s178_s7, %s178_s7 }
  0x24   : > { %p3611_p1 = scmp.ne.s32.totalorder %s178_s7, %s3610_s13  ;;  %p3619_p6 = scmp.lt.s32.totalorder %s3610_s13, %s3610_s13 }
  0x26   : > { %p3613_p13 = pnand %p3611_p1, %p3575_p12  ;;  %p3620_p5 = por %p3619_p6, %p3618_p2 }
  0x28   : > { %p3614_p0 = pneg %p3613_p13 }
  0x2a   : > { %p3621_p10 = pnand %p3620_p5, %p3614_p0 }
  0x2c   : > { %3624 = shalt.err (!%p3621_p10)
}
  0x2d   : > { %3079 = dma.hbm_to_vmem [thread:$0]  (!%p3844_p11), %s4143_s3, 384, %s178_s7, [#allocation8]  }
  0x2e   : > { %s3867_s16 = sadd.s32 1, %s3753_s23   ;;  %s33_s17 = sadd.s32 1, %s3749_s22 }
  0x2f   : > { %s30_s18 = ssub.s32 %s3753_s23, %s3867_s16  ;;  %p40_p1 = scmp.ne.s32.totalorder %s3749_s22, %s3745_s21 }
  0x30   : > { %p31_p2 = scmp.eq.s32.totalorder %s30_s18, 0  ;;  %p41_p6 = scmp.eq.s32.totalorder %s3753_s23, 0 }
  0x31   : > { %p4155_p12 = scmp.eq.s32.totalorder %s3816_s0, 1  ;;  %p3093_p7 = scmp.lt.s32.totalorder %s3753_s23, 2 }
  0x32   : > { %s3883_s24 = scalar_select %p31_p2, %s3749_s22, %s33_s17  }
  0x33   : > { %p3877_p3 = por %p4155_p12, %p40_p1  ;;  %p42_p9 = por %p41_p6, %p40_p1 }
  0x34   : > { %s3886_s28 = sand.u32 1, %s3749_s22   ;;  %s3054_s30 = smul.u32 384, %s3753_s23 }
  0x35   : > { %s4156_s19 = scalar_select %p3877_p3, 1, 0 }
  0x36   : > { %s4147_s29 = smul.u32 24, %s3886_s28  ;;  %p3890_p11 = pnand %p3093_p7, %p42_p9 }
  0x37   : > { %s3899_s9 = scalar_lea.hbm %s4141_s1, %s3054_s30  ;;  %s189_s12 = scalar_lea.sflag [#allocation5], %s3886_s28 }
  0x38   : > { %s192_s10 = scalar_lea.vmem [#allocation4], %s4147_s29  ;;  %s3625_s13 = scalar_lea.hbm %s3899_s9, 384 }
  0x39   : > { %s200_s11 = sshll.u32 %s192_s10, 4  ;;  %p3626_p13 = scmp.ne.s32.totalorder %s3899_s9, %s3625_s13  ;;  %s201_s11 = int_to_ptr.vmem [resolvable:$true] %s200_s11 }
  0x3a   : > { %p3627_p0 = pneg %p3890_p11  ;;  %s3630_s17 = scalar_lea.hbm %s4141_s1, 768 }
  0x3b   : > { %p3631_p1 = scmp.lt.s32.totalorder %s3899_s9, %s4141_s1  ;;  %p3632_p2 = scmp.lt.s32.totalorder %s3630_s17, %s3625_s13 }
  0x3c   : > { %p3628_p5 = pnand %p3627_p0, %p3626_p13 }
  0x3d   : > { %p3633_p6 = por %p3632_p2, %p3631_p1 }
  0x3e   : > { %p3629_p10 = pneg %p3628_p5 }
  0x40   : > { %p3634_p12 = pnand %p3633_p6, %p3629_p10 }
  0x42   : > { %3637 = shalt.err (!%p3634_p12)
}
  0x43   : > { %s3638_s8 = scalar_lea.vmem %s201_s11, 384  ;;  %s3759_s10 = smov [#allocation4]  }
  0x44   : > { %p3639_p7 = scmp.ne.s32.totalorder %s201_s11, %s3638_s8  ;;  %s3643_s29 = sshll.u32 %s3759_s10, 4  ;;  %s3644_s29 = int_to_ptr.vmem [resolvable:$false] %s3643_s29 }
  0x45   : > { %s3645_s14 = scalar_lea.vmem %s3644_s29, 768  ;;  %p3646_p5 = scmp.lt.s32.totalorder %s201_s11, %s3644_s29 }
  0x46   : > { %p3641_p9 = pnand %p3639_p7, %p3627_p0  ;;  %p3647_p3 = scmp.lt.s32.totalorder %s3645_s14, %s3638_s8 }
  0x48   : > { %p3642_p13 = pneg %p3641_p9  ;;  %p3648_p4 = por %p3647_p3, %p3646_p5 }
  0x4a   : > { %p3649_p8 = pnand %p3648_p4, %p3642_p13 }
  0x4c   : > { %3652 = shalt.err (!%p3649_p8)
}
  0x4d   : > { %3083 = dma.hbm_to_vmem [thread:$0]  (!%p3890_p11), %s3899_s9, 384, %s201_s11, %s189_s12  }
  0x4e   : > { %s3929_s17 = scalar_lea.hbm %s4144_s4, %s3054_s30  ;;  %s4158_s18 = smul.u32 24, %s3886_s28 }
  0x4f   : > { %s208_s8 = scalar_lea.sflag [#allocation11], %s3886_s28  ;;  %s3653_s10 = scalar_lea.hbm %s3929_s17, 384 }
  0x50   : > { %s211_s29 = scalar_lea.vmem [#allocation10], %s4158_s18  ;;  %p3654_p4 = scmp.ne.s32.totalorder %s3929_s17, %s3653_s10 }
  0x51   : > { %s219_s7 = sshll.u32 %s211_s29, 4  ;;  %s3658_s12 = scalar_lea.hbm %s4144_s4, 768  ;;  %s220_s7 = int_to_ptr.vmem [resolvable:$true] %s219_s7 }
  0x52   : > { %p3656_p8 = pnand %p3654_p4, %p3627_p0  ;;  %p3659_p10 = scmp.lt.s32.totalorder %s3929_s17, %s4144_s4 }
  0x53   : > { %p3660_p1 = scmp.lt.s32.totalorder %s3658_s12, %s3653_s10 }
  0x54   : > { %p3657_p3 = pneg %p3656_p8 }
  0x55   : > { %p3661_p2 = por %p3660_p1, %p3659_p10 }
  0x57   : > { %p3662_p6 = pnand %p3661_p2, %p3657_p3 }
  0x59   : > { %3665 = shalt.err (!%p3662_p6)
}
  0x5a   : > { %s3666_s13 = scalar_lea.vmem %s220_s7, 384  ;;  %s3760_s28 = smov [#allocation10]  }
  0x5b   : > { %p3667_p12 = scmp.ne.s32.totalorder %s220_s7, %s3666_s13  ;;  %s3671_s15 = sshll.u32 %s3760_s28, 4  ;;  %s3672_s15 = int_to_ptr.vmem [resolvable:$false] %s3671_s15 }
  0x5c   : > { %s3673_s18 = scalar_lea.vmem %s3672_s15, 768  ;;  %p3674_p13 = scmp.lt.s32.totalorder %s220_s7, %s3672_s15 }
  0x5d   : > { %p3669_p7 = pnand %p3667_p12, %p3627_p0  ;;  %p3675_p5 = scmp.lt.s32.totalorder %s3673_s18, %s3666_s13 }
  0x5f   : > { %p3670_p9 = pneg %p3669_p7  ;;  %p3676_p4 = por %p3675_p5, %p3674_p13 }
  0x61   : > { %p3677_p8 = pnand %p3676_p4, %p3670_p9 }
  0x63   : > { %3680 = shalt.err (!%p3677_p8)
}
  0x64   : > { %3086 = dma.hbm_to_vmem [thread:$0]  (!%p3890_p11), %s3929_s17, 384, %s220_s7, %s208_s8  }
  0x65   : > { %p4159_p3 = scmp.ne.s32.totalorder %s4153_s27, 0 }
  0x66   : > { %s3955_s29 = sand.u32 (!%p4159_p3), 1, %s3745_s21   ;;  %p4160_p0 = scmp.ne.s32.totalorder (!%p4159_p3), %s4151_s25, 0 }
  0x67   : > { %228 = sbr.rel (%p4159_p3) target bundleno = 828 (0x33c), region = 36  ;;  %s231_s9 = scalar_lea.sflag (!%p4159_p3), [#allocation5], %s3955_s29 }
  0x68   : > { %s3958_s10 = smul.u32 (!%p4159_p3), 24, %s3955_s29 }
  0x6a   : > { %s3962_s11 = scalar_lea.vmem (!%p4159_p3), [#allocation4], %s3958_s10 }
  0x6c   : > { %3724 = dma.done.wait (%p4160_p0), %s231_s9, 384  }
  0x6d   : > { %3726 = vsyncadd (%p4160_p0), %s231_s9, 4294966912  ;;  %p4161_p11 = scmp.eq.s32.totalorder %s3816_s0, 0 }
  0x6f   : > { %3728 = dma.done.wait (%p4161_p11), [#allocation8], 37248   ;;  %p4162_p10 = pmov %p4161_p11 }
  0x70   : > { %s248_s27 = scalar_lea.sflag [#allocation11], %s3955_s29  ;;  %s3974_s6 = scalar_lea.vmem [#allocation10], %s3958_s10 }
  0x71   : > { %3730 = vsyncadd (%p4162_p10), [#allocation8], 4294930048 }
  0x72   : > { %3732 = dma.done.wait (%p4160_p0), %s248_s27, 384  }
  0x73   : > { %3734 = vsyncadd (%p4160_p0), %s248_s27, 4294966912  ;;  %v3133_v0 = vld [vmem:[#allocation7 + $0x154] ss:$24 sps:$4 sm:$0xff]   ;;  %v3135_v1 = vld [vmem:[#allocation7 + $0x150] ss:$24 sps:$4 sm:$0xff]   ;;  %s2566_s25 = sld [smem:[#allocation3]] }
  0x74   : > { %2069 = vmatprep.subr.bf16.mxu0 %v3133_v0  ;;  %v3136_v2 = vld [vmem:[#allocation7 + $0x454] ss:$24 sps:$4 sm:$0xff]   ;;  %v3138_v3 = vld [vmem:[#allocation7 + $0x450] ss:$24 sps:$4 sm:$0xff]   ;;  %v3139_v4 = vld [vmem:[#allocation7 + $0x124] ss:$24 sps:$4 sm:$0xff]  }
  0x75   : > { %2070 = vmatpush1.bf16.msra.mxu0 %v3135_v1  ;;  %v3141_v5 = vld [vmem:[#allocation7 + $0x120] ss:$24 sps:$4 sm:$0xff]   ;;  %2110 = vmatprep.subr.bf16.mxu1 %v3136_v2  ;;  %v3142_v6 = vld [vmem:[#allocation7 + $0x424] ss:$24 sps:$4 sm:$0xff]   ;;  %v3145_v8 = vld [vmem:[#allocation7 + $0xf4] ss:$24 sps:$4 sm:$0xff]  }
  0x76   : > { %2111 = vmatpush1.bf16.msra.mxu1 %v3138_v3  ;;  %2071 = vmatprep.subr.bf16.mxu0 %v3139_v4  ;;  %v3144_v7 = vld [vmem:[#allocation7 + $0x420] ss:$24 sps:$4 sm:$0xff]   ;;  %v3147_v9 = vld [vmem:[#allocation7 + $0xf0] ss:$24 sps:$4 sm:$0xff]   ;;  %v3148_v10 = vld [vmem:[#allocation7 + $0x3f4] ss:$24 sps:$4 sm:$0xff]  }
  0x77   : > { %2112 = vmatprep.subr.bf16.mxu1 %v3142_v6  ;;  %v3151_v11 = vld [vmem:[#allocation7 + $0xc4] ss:$24 sps:$4 sm:$0xff]   ;;  %v3150_v12 = vld [vmem:[#allocation7 + $0x3f0] ss:$24 sps:$4 sm:$0xff]   ;;  %v3153_v14 = vld [vmem:[#allocation7 + $0xc0] ss:$24 sps:$4 sm:$0xff]  }
  0x78   : > { %v3154_v13 = vld [vmem:[#allocation7 + $0x3c4] ss:$24 sps:$4 sm:$0xff]   ;;  %v3157_v15 = vld [vmem:[#allocation7 + $0x94] ss:$24 sps:$4 sm:$0xff]   ;;  %v3156_v16 = vld [vmem:[#allocation7 + $0x3c0] ss:$24 sps:$4 sm:$0xff]  }
  0x79   : > { %2072 = vmatpush1.bf16.msra.mxu0 %v3141_v5  ;;  %v3160_v17 = vld [vmem:[#allocation7 + $0x394] ss:$24 sps:$4 sm:$0xff]   ;;  %v3159_v18 = vld [vmem:[#allocation7 + $0x90] ss:$24 sps:$4 sm:$0xff]   ;;  %v3163_v19 = vld [vmem:[#allocation7 + $0x64] ss:$24 sps:$4 sm:$0xff]  }
  0x7a   : > { %2073 = vmatprep.subr.bf16.mxu0 %v3145_v8  ;;  %2113 = vmatpush1.bf16.msra.mxu1 %v3144_v7  ;;  %v3162_v20 = vld [vmem:[#allocation7 + $0x390] ss:$24 sps:$4 sm:$0xff]   ;;  %v3166_v21 = vld [vmem:[#allocation7 + $0x364] ss:$24 sps:$4 sm:$0xff]   ;;  %v3165_v22 = vld [vmem:[#allocation7 + $0x60] ss:$24 sps:$4 sm:$0xff]  }
  0x7b   : > { %2114 = vmatprep.subr.bf16.mxu1 %v3148_v10  ;;  %v3169_v23 = vld [vmem:[#allocation7 + $0x34] ss:$24 sps:$4 sm:$0xff]   ;;  %v3168_v24 = vld [vmem:[#allocation7 + $0x360] ss:$24 sps:$4 sm:$0xff]   ;;  %v3171_v26 = vld [vmem:[#allocation7 + $0x30] ss:$24 sps:$4 sm:$0xff]  }
  0x7c   : > { %v3172_v25 = vld [vmem:[#allocation7 + $0x334] ss:$24 sps:$4 sm:$0xff]   ;;  %v3175_v27 = vld [vmem:[#allocation7 + $0x4] ss:$24 sps:$4 sm:$0xff]   ;;  %v3174_v28 = vld [vmem:[#allocation7 + $0x330] ss:$24 sps:$4 sm:$0xff]  }
  0x7d   : > { %2074 = vmatpush1.bf16.msra.mxu0 %v3147_v9  ;;  %v3178_v29 = vld [vmem:[#allocation7 + $0x304] ss:$24 sps:$4 sm:$0xff]   ;;  %v3177_v30 = vld [vmem:[#allocation7] ss:$24 sps:$4 sm:$0xff]   ;;  %v3181_v31 = vld [vmem:[#allocation7 + $0x2d4] ss:$24 sps:$4 sm:$0xff]  }
  0x7e   : > { %2075 = vmatprep.subr.bf16.mxu0 %v3151_v11  ;;  %2115 = vmatpush1.bf16.msra.mxu1 %v3150_v12  ;;  %v3180_v32 = vld [vmem:[#allocation7 + $0x300] ss:$24 sps:$4 sm:$0xff]   ;;  %v3184_v33 = vld [vmem:[#allocation7 + $0x5d4] ss:$24 sps:$4 sm:$0xff]   ;;  %v3183_v34 = vld [vmem:[#allocation7 + $0x2d0] ss:$24 sps:$4 sm:$0xff]  }
  0x7f   : > { %2116 = vmatprep.subr.bf16.mxu1 %v3154_v13  ;;  %v3187_v35 = vld [vmem:[#allocation7 + $0x2a4] ss:$24 sps:$4 sm:$0xff]   ;;  %v3186_v36 = vld [vmem:[#allocation7 + $0x5d0] ss:$24 sps:$4 sm:$0xff]   ;;  %v3189_v38 = vld [vmem:[#allocation7 + $0x2a0] ss:$24 sps:$4 sm:$0xff]  }
  0x80   : > { %v3190_v37 = vld [vmem:[#allocation7 + $0x5a4] ss:$24 sps:$4 sm:$0xff]   ;;  %v3193_v39 = vld [vmem:[#allocation7 + $0x274] ss:$24 sps:$4 sm:$0xff]   ;;  %v3192_v40 = vld [vmem:[#allocation7 + $0x5a0] ss:$24 sps:$4 sm:$0xff]  }
  0x81   : > { %2076 = vmatpush1.bf16.msra.mxu0 %v3153_v14  ;;  %v3196_v41 = vld [vmem:[#allocation7 + $0x574] ss:$24 sps:$4 sm:$0xff]   ;;  %v3195_v42 = vld [vmem:[#allocation7 + $0x270] ss:$24 sps:$4 sm:$0xff]   ;;  %v3199_v43 = vld [vmem:[#allocation7 + $0x244] ss:$24 sps:$4 sm:$0xff]  }
  0x82   : > { %2077 = vmatprep.subr.bf16.mxu0 %v3157_v15  ;;  %2117 = vmatpush1.bf16.msra.mxu1 %v3156_v16  ;;  %v3198_v44 = vld [vmem:[#allocation7 + $0x570] ss:$24 sps:$4 sm:$0xff]   ;;  %v3202_v45 = vld [vmem:[#allocation7 + $0x544] ss:$24 sps:$4 sm:$0xff]   ;;  %v3201_v47 = vld [vmem:[#allocation7 + $0x240] ss:$24 sps:$4 sm:$0xff]  }
  0x83   : > { %2118 = vmatprep.subr.bf16.mxu1 %v3160_v17  ;;  %v281_v46 = vld [vmem:[%s3962_s11] sm:$0xff]  ;;  %v282_v50 = vld [vmem:[%s3962_s11 + $0x8] sm:$0xff]  ;;  %s3058_s17 = smul.u32 384, %s3816_s0  ;;  %s280_s7 = scalar_lea.vmem [#allocation12], %s3958_s10 }
  0x84   : > { %v3981_v48 = vcombine.high %v281_v46, %v281_v46  ;;  %v3205_v49 = vld [vmem:[#allocation7 + $0x214] ss:$24 sps:$4 sm:$0xff]   ;;  %v3204_v51 = vld [vmem:[#allocation7 + $0x540] ss:$24 sps:$4 sm:$0xff]   ;;  %v3985_v52 = vcombine.high %v282_v50, %v282_v50  ;;  %v3207_v54 = vld [vmem:[#allocation7 + $0x210] ss:$24 sps:$4 sm:$0xff]   ;;  %v3988_v5 = vcombine.low %v281_v46, %v281_v46  ;;  %v3990_v8 = vcombine.low %v282_v50, %v282_v50 }
  0x85   : > { %2078 = vmatpush1.bf16.msra.mxu0 %v3159_v18  ;;  %v3208_v53 = vld [vmem:[#allocation7 + $0x514] ss:$24 sps:$4 sm:$0xff]   ;;  %v3211_v55 = vld [vmem:[#allocation7 + $0x1e4] ss:$24 sps:$4 sm:$0xff]   ;;  %v3210_v56 = vld [vmem:[#allocation7 + $0x510] ss:$24 sps:$4 sm:$0xff]   ;;  %s4097_s0 = scalar_lea.hbm %s4145_s5, %s3058_s17 }
  0x86   : > { %2079 = vmatprep.subr.bf16.mxu0 %v3163_v19  ;;  %2119 = vmatpush1.bf16.msra.mxu1 %v3162_v20  ;;  %v3214_v57 = vld [vmem:[#allocation7 + $0x4e4] ss:$24 sps:$4 sm:$0xff]   ;;  %v3213_v58 = vld [vmem:[#allocation7 + $0x1e0] ss:$24 sps:$4 sm:$0xff]   ;;  %v3217_v59 = vld [vmem:[#allocation7 + $0x1b4] ss:$24 sps:$4 sm:$0xff]  }
  0x87   : > { %2120 = vmatprep.subr.bf16.mxu1 %v3166_v21  ;;  %2101 = vmatprep.mubr.bf16.mxu0 %v3981_v48  ;;  %v3216_v60 = vld [vmem:[#allocation7 + $0x4e0] ss:$24 sps:$4 sm:$0xff]   ;;  %v3220_v61 = vld [vmem:[#allocation7 + $0x4b4] ss:$24 sps:$4 sm:$0xff]   ;;  %v3219_v62 = vld [vmem:[#allocation7 + $0x1b0] ss:$24 sps:$4 sm:$0xff]  }
  0x88   : > { %2142 = vmatprep.mubr.bf16.mxu1 %v3985_v52  ;;  %v3223_v63 = vld [vmem:[#allocation7 + $0x184] ss:$24 sps:$4 sm:$0xff]   ;;  %v3222_v0 = vld [vmem:[#allocation7 + $0x4b0] ss:$24 sps:$4 sm:$0xff]   ;;  %v3225_v2 = vld [vmem:[#allocation7 + $0x180] ss:$24 sps:$4 sm:$0xff]  }
  0x89   : > { %2080 = vmatpush1.bf16.msra.mxu0 %v3165_v22  ;;  %v3226_v1 = vld [vmem:[#allocation7 + $0x484] ss:$24 sps:$4 sm:$0xff]   ;;  %v3233_v3 = vld [vmem:[#allocation7 + $0x754] ss:$24 sps:$4 sm:$0xff]   ;;  %v3229_v4 = vld [vmem:[#allocation7 + $0x480] ss:$24 sps:$4 sm:$0xff]  }
  0x8a   : > { %2081 = vmatprep.subr.bf16.mxu0 %v3169_v23  ;;  %2121 = vmatpush1.bf16.msra.mxu1 %v3168_v24  ;;  %v3238_v6 = vld [vmem:[#allocation7 + $0x15c] ss:$24 sps:$4 sm:$0xff]   ;;  %v3231_v7 = vld [vmem:[#allocation7 + $0x750] ss:$24 sps:$4 sm:$0xff]   ;;  %v3244_v11 = vld [vmem:[#allocation7 + $0x12c] ss:$24 sps:$4 sm:$0xff]  }
  0x8b   : > { %2122 = vmatprep.subr.bf16.mxu1 %v3172_v25  ;;  %v3241_v9 = vld [vmem:[#allocation7 + $0x724] ss:$24 sps:$4 sm:$0xff]   ;;  %v3236_v10 = vld [vmem:[#allocation7 + $0x158] ss:$24 sps:$4 sm:$0xff]   ;;  %v3247_v13 = vld [vmem:[#allocation7 + $0x6f4] ss:$24 sps:$4 sm:$0xff]  }
  0x8c   : > { %v3239_v12 = vld [vmem:[#allocation7 + $0x720] ss:$24 sps:$4 sm:$0xff]   ;;  %v3250_v15 = vld [vmem:[#allocation7 + $0xfc] ss:$24 sps:$4 sm:$0xff]   ;;  %v3245_v16 = vld [vmem:[#allocation7 + $0x6f0] ss:$24 sps:$4 sm:$0xff]  }
  0x8d   : > { %2082 = vmatpush1.bf16.msra.mxu0 %v3171_v26  ;;  %v3242_v14 = vld [vmem:[#allocation7 + $0x128] ss:$24 sps:$4 sm:$0xff]   ;;  %v3253_v17 = vld [vmem:[#allocation7 + $0x6c4] ss:$24 sps:$4 sm:$0xff]   ;;  %v3248_v18 = vld [vmem:[#allocation7 + $0xf8] ss:$24 sps:$4 sm:$0xff]  }
  0x8e   : > { %2083 = vmatprep.subr.bf16.mxu0 %v3175_v27  ;;  %2123 = vmatpush1.bf16.msra.mxu1 %v3174_v28  ;;  %v3256_v19 = vld [vmem:[#allocation7 + $0xcc] ss:$24 sps:$4 sm:$0xff]   ;;  %v3251_v20 = vld [vmem:[#allocation7 + $0x6c0] ss:$24 sps:$4 sm:$0xff]   ;;  %v3262_v23 = vld [vmem:[#allocation7 + $0x9c] ss:$24 sps:$4 sm:$0xff]  }
  0x8f   : > { %2124 = vmatprep.subr.bf16.mxu1 %v3178_v29  ;;  %v3259_v21 = vld [vmem:[#allocation7 + $0x694] ss:$24 sps:$4 sm:$0xff]   ;;  %v3254_v22 = vld [vmem:[#allocation7 + $0xc8] ss:$24 sps:$4 sm:$0xff]   ;;  %v3265_v25 = vld [vmem:[#allocation7 + $0x664] ss:$24 sps:$4 sm:$0xff]  }
  0x90   : > { %v3257_v24 = vld [vmem:[#allocation7 + $0x690] ss:$24 sps:$4 sm:$0xff]   ;;  %v3268_v27 = vld [vmem:[#allocation7 + $0x6c] ss:$24 sps:$4 sm:$0xff]   ;;  %v3263_v28 = vld [vmem:[#allocation7 + $0x660] ss:$24 sps:$4 sm:$0xff]  }
  0x91   : > { %2084 = vmatpush1.bf16.msra.mxu0 %v3177_v30  ;;  %v3260_v26 = vld [vmem:[#allocation7 + $0x98] ss:$24 sps:$4 sm:$0xff]   ;;  %v3271_v29 = vld [vmem:[#allocation7 + $0x634] ss:$24 sps:$4 sm:$0xff]   ;;  %v3266_v30 = vld [vmem:[#allocation7 + $0x68] ss:$24 sps:$4 sm:$0xff]  }
  0x92   : > { %2085 = vmatprep.subr.bf16.mxu0 %v3181_v31  ;;  %2125 = vmatpush1.bf16.msra.mxu1 %v3180_v32  ;;  %v3274_v31 = vld [vmem:[#allocation7 + $0x3c] ss:$24 sps:$4 sm:$0xff]   ;;  %v3287_v46 = vld [vmem:[#allocation7 + $0x8a0] ss:$24 sps:$4 sm:$0xff]   ;;  %s2628_s8 = sshll.u32 %s280_s7, 4  ;;  %s2614_s14 = scalar_lea.sflag [#allocation6], %s3955_s29  ;;  %s4099_s8 = int_to_ptr.vmem [resolvable:$true] %s2628_s8 }
  0x93   : > { %2126 = vmatprep.subr.bf16.mxu1 %v3184_v33  ;;  %v3996_v32 = vld [vmem:[%s3962_s11 + $0x10] sm:$0xff]  ;;  %v3269_v33 = vld [vmem:[#allocation7 + $0x630] ss:$24 sps:$4 sm:$0xff]   ;;  %s3681_s13 = scalar_lea.vmem %s4099_s8, 384  ;;  %p4163_p2 = scmp.ne.s32.totalorder %s4156_s19, 0 }
  0x94   : > { %v3298_v50 = vld [vmem:[#allocation7 + $0x27c] ss:$24 sps:$4 sm:$0xff]   ;;  %p3682_p1 = scmp.ne.s32.totalorder %s4099_s8, %s3681_s13  ;;  %s3761_s28 = smov [#allocation12]  }
  0x95   : > { %2086 = vmatpush2.bf16.msra.mxu0 %v3183_v34  ;;  %v4000_v34 = vcombine.high %v3996_v32, %v3996_v32  ;;  %s3685_s15 = sshll.u32 %s3761_s28, 4  ;;  %s3686_s15 = int_to_ptr.vmem [resolvable:$false] %s3685_s15 }
  0x96   : > { %2087 = vmatprep.subr.bf16.mxu0 %v3187_v35  ;;  %2127 = vmatpush2.bf16.msra.mxu1 %v3186_v36  ;;  %v3277_v35 = vld [vmem:[#allocation7 + $0x604] ss:$24 sps:$4 sm:$0xff]   ;;  %v3272_v36 = vld [vmem:[#allocation7 + $0x38] ss:$24 sps:$4 sm:$0xff]   ;;  %p3683_p6 = pnand %p3682_p1, %p4163_p2  ;;  %s3687_s18 = scalar_lea.vmem %s3686_s15, 768 }
  0x97   : > { %2128 = vmatprep.subr.bf16.mxu1 %v3190_v37  ;;  %v3280_v37 = vld [vmem:[#allocation7 + $0xc] ss:$24 sps:$4 sm:$0xff]   ;;  %p3688_p7 = scmp.lt.s32.totalorder %s4099_s8, %s3686_s15  ;;  %p3689_p9 = scmp.lt.s32.totalorder %s3687_s18, %s3681_s13 }
  0x98   : > { %p3684_p12 = pneg %p3683_p6 }
  0x99   : > { %2088 = vmatpush2.bf16.msra.mxu0 %v3189_v38  ;;  %v3275_v38 = vld [vmem:[#allocation7 + $0x600] ss:$24 sps:$4 sm:$0xff]   ;;  %p3690_p13 = por %p3689_p9, %p3688_p7 }
  0x9a   : > { %2089 = vmatprep.subr.bf16.mxu0 %v3193_v39  ;;  %2129 = vmatpush2.bf16.msra.mxu1 %v3192_v40  ;;  %v3283_v39 = vld [vmem:[#allocation7 + $0x8d4] ss:$24 sps:$4 sm:$0xff]   ;;  %v3278_v40 = vld [vmem:[#allocation7 + $0x8] ss:$24 sps:$4 sm:$0xff]  }
  0x9b   : > { %2130 = vmatprep.subr.bf16.mxu1 %v3196_v41  ;;  %v3286_v41 = vld [vmem:[#allocation7 + $0x2dc] ss:$24 sps:$4 sm:$0xff]   ;;  %p3691_p5 = pnand %p3690_p13, %p3684_p12 }
  0x9d   : > { %2090 = vmatpush2.bf16.msra.mxu0 %v3195_v42  ;;  %v3281_v42 = vld [vmem:[#allocation7 + $0x8d0] ss:$24 sps:$4 sm:$0xff]  }
  0x9e   : > { %2091 = vmatprep.subr.bf16.mxu0 %v3199_v43  ;;  %2131 = vmatpush2.bf16.msra.mxu1 %v3198_v44  ;;  %v3289_v43 = vld [vmem:[#allocation7 + $0x8a4] ss:$24 sps:$4 sm:$0xff]   ;;  %v3284_v44 = vld [vmem:[#allocation7 + $0x2d8] ss:$24 sps:$4 sm:$0xff]  }
  0x9f   : > { %2132 = vmatprep.subr.bf16.mxu1 %v3202_v45  ;;  %v3292_v45 = vld [vmem:[#allocation7 + $0x2ac] ss:$24 sps:$4 sm:$0xff]  }
  0xa1   : > { %2092 = vmatpush2.bf16.msra.mxu0 %v3201_v47  ;;  %v3295_v47 = vld [vmem:[#allocation7 + $0x874] ss:$24 sps:$4 sm:$0xff]  }
  0xa2   : > { %2093 = vmatprep.subr.bf16.mxu0 %v3205_v49  ;;  %2133 = vmatpush2.bf16.msra.mxu1 %v3204_v51  ;;  %v3290_v49 = vld [vmem:[#allocation7 + $0x2a8] ss:$24 sps:$4 sm:$0xff]  }
  0xa3   : > { %2134 = vmatprep.subr.bf16.mxu1 %v3208_v53  ;;  %v3293_v51 = vld [vmem:[#allocation7 + $0x870] ss:$24 sps:$4 sm:$0xff]   ;;  %v3301_v53 = vld [vmem:[#allocation7 + $0x844] ss:$24 sps:$4 sm:$0xff]  }
  0xa5   : > { %2094 = vmatpush2.bf16.msra.mxu0 %v3207_v54  ;;  %v3296_v54 = vld [vmem:[#allocation7 + $0x278] ss:$24 sps:$4 sm:$0xff]  }
  0xa6   : > { %2095 = vmatprep.subr.bf16.mxu0 %v3211_v55  ;;  %2135 = vmatpush2.bf16.msra.mxu1 %v3210_v56  ;;  %v3304_v55 = vld [vmem:[#allocation7 + $0x24c] ss:$24 sps:$4 sm:$0xff]   ;;  %v3299_v56 = vld [vmem:[#allocation7 + $0x840] ss:$24 sps:$4 sm:$0xff]  }
  0xa7   : > { %2136 = vmatprep.subr.bf16.mxu1 %v3214_v57  ;;  %v3307_v57 = vld [vmem:[#allocation7 + $0x814] ss:$24 sps:$4 sm:$0xff]  }
  0xa9   : > { %2096 = vmatpush2.bf16.msra.mxu0 %v3213_v58  ;;  %v3302_v58 = vld [vmem:[#allocation7 + $0x248] ss:$24 sps:$4 sm:$0xff]  }
  0xaa   : > { %2097 = vmatprep.subr.bf16.mxu0 %v3217_v59  ;;  %2137 = vmatpush2.bf16.msra.mxu1 %v3216_v60  ;;  %v3310_v59 = vld [vmem:[#allocation7 + $0x21c] ss:$24 sps:$4 sm:$0xff]   ;;  %v3305_v60 = vld [vmem:[#allocation7 + $0x810] ss:$24 sps:$4 sm:$0xff]  }
  0xab   : > { %2138 = vmatprep.subr.bf16.mxu1 %v3220_v61  ;;  %v3313_v61 = vld [vmem:[#allocation7 + $0x7e4] ss:$24 sps:$4 sm:$0xff]  }
  0xad   : > { %2098 = vmatpush2.bf16.msra.mxu0 %v3219_v62  ;;  %v3308_v62 = vld [vmem:[#allocation7 + $0x218] ss:$24 sps:$4 sm:$0xff]  }
  0xae   : > { %2099 = vmatprep.subr.bf16.mxu0 %v3223_v63  ;;  %2139 = vmatpush2.bf16.msra.mxu1 %v3222_v0  ;;  %v3316_v63 = vld [vmem:[#allocation7 + $0x1ec] ss:$24 sps:$4 sm:$0xff]   ;;  %v3311_v0 = vld [vmem:[#allocation7 + $0x7e0] ss:$24 sps:$4 sm:$0xff]  }
  0xaf   : > { %2140 = vmatprep.subr.bf16.mxu1 %v3226_v1  ;;  %v3319_v1 = vld [vmem:[#allocation7 + $0x7b4] ss:$24 sps:$4 sm:$0xff]  }
  0xb1   : > { %2100 = vmatpush2.bf16.msra.mxu0 %v3225_v2  ;;  %v3314_v2 = vld [vmem:[#allocation7 + $0x1e8] ss:$24 sps:$4 sm:$0xff]  }
  0xb2   : > { %2151 = vmatprep.subr.bf16.mxu0 %v3233_v3  ;;  %2141 = vmatpush2.bf16.msra.mxu1 %v3229_v4  ;;  %v3322_v3 = vld [vmem:[#allocation7 + $0x1bc] ss:$24 sps:$4 sm:$0xff]   ;;  %v3317_v4 = vld [vmem:[#allocation7 + $0x7b0] ss:$24 sps:$4 sm:$0xff]  }
  0xb3   : > { %2192 = vmatprep.subr.bf16.mxu1 %v3238_v6  ;;  %v3325_v6 = vld [vmem:[#allocation7 + $0x784] ss:$24 sps:$4 sm:$0xff]  }
  0xb4   : > { %2102 = vmatmul.mubr.bf16.vlgmr.msra.gmra.mxu0 %v3988_v5 }
  0xb5   : > { %2152 = vmatpush1.bf16.msra.mxu0 %v3231_v7  ;;  %2143 = vmatmul.mubr.bf16.vlgmr.msra.gmra.mxu1 %v3990_v8  ;;  %v3320_v7 = vld [vmem:[#allocation7 + $0x1b8] ss:$24 sps:$4 sm:$0xff]  }
  0xb6   : > { %2153 = vmatprep.subr.bf16.mxu0 %v3241_v9  ;;  %2193 = vmatpush1.bf16.msra.mxu1 %v3236_v10  ;;  %v3328_v9 = vld [vmem:[#allocation7 + $0x18c] ss:$24 sps:$4 sm:$0xff]   ;;  %v3323_v10 = vld [vmem:[#allocation7 + $0x780] ss:$24 sps:$4 sm:$0xff]  }
  0xb7   : > { %2224 = vmatprep.mubr.bf16.mxu1 %v3981_v48  ;;  %2194 = vmatprep.subr.bf16.mxu1 %v3244_v11  ;;  %v3333_v11 = vld [vmem:[#allocation7 + $0x45c] ss:$24 sps:$4 sm:$0xff]  }
  0xb8   : > { %2183 = vmatprep.mubr.bf16.mxu0 %v4000_v34 }
  0xb9   : > { %2154 = vmatpush1.bf16.msra.mxu0 %v3239_v12  ;;  %v3326_v12 = vld [vmem:[#allocation7 + $0x188] ss:$24 sps:$4 sm:$0xff]  }
  0xba   : > { %2155 = vmatprep.subr.bf16.mxu0 %v3247_v13  ;;  %2195 = vmatpush1.bf16.msra.mxu1 %v3242_v14  ;;  %v4005_v13 = vcombine.low %v3996_v32, %v3996_v32  ;;  %v3336_v14 = vld [vmem:[#allocation7 + $0x75c] ss:$24 sps:$4 sm:$0xff]   ;;  %v3363_v32 = vld [vmem:[#allocation7 + $0x36c] ss:$24 sps:$4 sm:$0xff]  }
  0xbb   : > { %2196 = vmatprep.subr.bf16.mxu1 %v3250_v15  ;;  %v3331_v15 = vld [vmem:[#allocation7 + $0x458] ss:$24 sps:$4 sm:$0xff]  }
  0xbd   : > { %2156 = vmatpush1.bf16.msra.mxu0 %v3245_v16  ;;  %v3339_v16 = vld [vmem:[#allocation7 + $0x42c] ss:$24 sps:$4 sm:$0xff]  }
  0xbe   : > { %2157 = vmatprep.subr.bf16.mxu0 %v3253_v17  ;;  %2197 = vmatpush1.bf16.msra.mxu1 %v3248_v18  ;;  %v3334_v17 = vld [vmem:[#allocation7 + $0x758] ss:$24 sps:$4 sm:$0xff]   ;;  %v3342_v18 = vld [vmem:[#allocation7 + $0x72c] ss:$24 sps:$4 sm:$0xff]  }
  0xbf   : > { %2198 = vmatprep.subr.bf16.mxu1 %v3256_v19  ;;  %v3337_v19 = vld [vmem:[#allocation7 + $0x428] ss:$24 sps:$4 sm:$0xff]  }
  0xc1   : > { %2158 = vmatpush1.bf16.msra.mxu0 %v3251_v20  ;;  %v3345_v20 = vld [vmem:[#allocation7 + $0x3fc] ss:$24 sps:$4 sm:$0xff]  }
  0xc2   : > { %2159 = vmatprep.subr.bf16.mxu0 %v3259_v21  ;;  %2199 = vmatpush1.bf16.msra.mxu1 %v3254_v22  ;;  %v3340_v21 = vld [vmem:[#allocation7 + $0x728] ss:$24 sps:$4 sm:$0xff]   ;;  %v3348_v22 = vld [vmem:[#allocation7 + $0x6fc] ss:$24 sps:$4 sm:$0xff]  }
  0xc3   : > { %2200 = vmatprep.subr.bf16.mxu1 %v3262_v23  ;;  %v3343_v23 = vld [vmem:[#allocation7 + $0x3f8] ss:$24 sps:$4 sm:$0xff]  }
  0xc5   : > { %2160 = vmatpush1.bf16.msra.mxu0 %v3257_v24  ;;  %v3351_v24 = vld [vmem:[#allocation7 + $0x3cc] ss:$24 sps:$4 sm:$0xff]  }
  0xc6   : > { %2161 = vmatprep.subr.bf16.mxu0 %v3265_v25  ;;  %2201 = vmatpush1.bf16.msra.mxu1 %v3260_v26  ;;  %v3346_v25 = vld [vmem:[#allocation7 + $0x6f8] ss:$24 sps:$4 sm:$0xff]   ;;  %v3354_v26 = vld [vmem:[#allocation7 + $0x6cc] ss:$24 sps:$4 sm:$0xff]  }
  0xc7   : > { %2202 = vmatprep.subr.bf16.mxu1 %v3268_v27  ;;  %v3349_v27 = vld [vmem:[#allocation7 + $0x3c8] ss:$24 sps:$4 sm:$0xff]  }
  0xc9   : > { %2162 = vmatpush1.bf16.msra.mxu0 %v3263_v28  ;;  %v3357_v28 = vld [vmem:[#allocation7 + $0x39c] ss:$24 sps:$4 sm:$0xff]  }
  0xca   : > { %2163 = vmatprep.subr.bf16.mxu0 %v3271_v29  ;;  %2203 = vmatpush1.bf16.msra.mxu1 %v3266_v30  ;;  %v3352_v29 = vld [vmem:[#allocation7 + $0x6c8] ss:$24 sps:$4 sm:$0xff]   ;;  %v3360_v30 = vld [vmem:[#allocation7 + $0x69c] ss:$24 sps:$4 sm:$0xff]  }
  0xcb   : > { %2204 = vmatprep.subr.bf16.mxu1 %v3274_v31  ;;  %v3355_v31 = vld [vmem:[#allocation7 + $0x398] ss:$24 sps:$4 sm:$0xff]  }
  0xcd   : > { %2164 = vmatpush1.bf16.msra.mxu0 %v3269_v33  ;;  %v3358_v33 = vld [vmem:[#allocation7 + $0x698] ss:$24 sps:$4 sm:$0xff]  }
  0xce   : > { %2165 = vmatprep.subr.bf16.mxu0 %v3277_v35  ;;  %2205 = vmatpush1.bf16.msra.mxu1 %v3272_v36  ;;  %v3366_v35 = vld [vmem:[#allocation7 + $0x66c] ss:$24 sps:$4 sm:$0xff]   ;;  %v3361_v36 = vld [vmem:[#allocation7 + $0x368] ss:$24 sps:$4 sm:$0xff]  }
  0xcf   : > { %2206 = vmatprep.subr.bf16.mxu1 %v3280_v37  ;;  %v3369_v37 = vld [vmem:[#allocation7 + $0x33c] ss:$24 sps:$4 sm:$0xff]  }
  0xd1   : > { %2166 = vmatpush1.bf16.msra.mxu0 %v3275_v38  ;;  %v3364_v38 = vld [vmem:[#allocation7 + $0x668] ss:$24 sps:$4 sm:$0xff]  }
  0xd2   : > { %2167 = vmatprep.subr.bf16.mxu0 %v3283_v39  ;;  %2207 = vmatpush1.bf16.msra.mxu1 %v3278_v40  ;;  %v3372_v39 = vld [vmem:[#allocation7 + $0x63c] ss:$24 sps:$4 sm:$0xff]   ;;  %v3367_v40 = vld [vmem:[#allocation7 + $0x338] ss:$24 sps:$4 sm:$0xff]  }
  0xd3   : > { %2208 = vmatprep.subr.bf16.mxu1 %v3286_v41  ;;  %v3375_v41 = vld [vmem:[#allocation7 + $0x30c] ss:$24 sps:$4 sm:$0xff]  }
  0xd5   : > { %2168 = vmatpush2.bf16.msra.mxu0 %v3281_v42  ;;  %v3370_v42 = vld [vmem:[#allocation7 + $0x638] ss:$24 sps:$4 sm:$0xff]  }
  0xd6   : > { %2169 = vmatprep.subr.bf16.mxu0 %v3289_v43  ;;  %2209 = vmatpush2.bf16.msra.mxu1 %v3284_v44  ;;  %v3378_v43 = vld [vmem:[#allocation7 + $0x60c] ss:$24 sps:$4 sm:$0xff]   ;;  %v3373_v44 = vld [vmem:[#allocation7 + $0x308] ss:$24 sps:$4 sm:$0xff]  }
  0xd7   : > { %2210 = vmatprep.subr.bf16.mxu1 %v3292_v45  ;;  %v3381_v45 = vld [vmem:[#allocation7 + $0x5dc] ss:$24 sps:$4 sm:$0xff]  }
  0xd9   : > { %2170 = vmatpush2.bf16.msra.mxu0 %v3287_v46  ;;  %v3376_v46 = vld [vmem:[#allocation7 + $0x608] ss:$24 sps:$4 sm:$0xff]  }
  0xda   : > { %2171 = vmatprep.subr.bf16.mxu0 %v3295_v47  ;;  %2211 = vmatpush2.bf16.msra.mxu1 %v3290_v49  ;;  %v3384_v47 = vld [vmem:[#allocation7 + $0x8dc] ss:$24 sps:$4 sm:$0xff]   ;;  %v3379_v49 = vld [vmem:[#allocation7 + $0x5d8] ss:$24 sps:$4 sm:$0xff]  }
  0xdb   : > { %2212 = vmatprep.subr.bf16.mxu1 %v3298_v50  ;;  %v3387_v50 = vld [vmem:[#allocation7 + $0x5ac] ss:$24 sps:$4 sm:$0xff]  }
  0xdd   : > { %2172 = vmatpush2.bf16.msra.mxu0 %v3293_v51  ;;  %v3382_v51 = vld [vmem:[#allocation7 + $0x8d8] ss:$24 sps:$4 sm:$0xff]  }
  0xde   : > { %2173 = vmatprep.subr.bf16.mxu0 %v3301_v53  ;;  %2213 = vmatpush2.bf16.msra.mxu1 %v3296_v54  ;;  %v3390_v53 = vld [vmem:[#allocation7 + $0x8ac] ss:$24 sps:$4 sm:$0xff]   ;;  %v3385_v54 = vld [vmem:[#allocation7 + $0x5a8] ss:$24 sps:$4 sm:$0xff]  }
  0xdf   : > { %2214 = vmatprep.subr.bf16.mxu1 %v3304_v55  ;;  %v3393_v55 = vld [vmem:[#allocation7 + $0x57c] ss:$24 sps:$4 sm:$0xff]  }
  0xe1   : > { %2174 = vmatpush2.bf16.msra.mxu0 %v3299_v56  ;;  %v3388_v56 = vld [vmem:[#allocation7 + $0x8a8] ss:$24 sps:$4 sm:$0xff]  }
  0xe2   : > { %2175 = vmatprep.subr.bf16.mxu0 %v3307_v57  ;;  %2215 = vmatpush2.bf16.msra.mxu1 %v3302_v58  ;;  %v3396_v57 = vld [vmem:[#allocation7 + $0x87c] ss:$24 sps:$4 sm:$0xff]   ;;  %v3391_v58 = vld [vmem:[#allocation7 + $0x578] ss:$24 sps:$4 sm:$0xff]  }
  0xe3   : > { %2216 = vmatprep.subr.bf16.mxu1 %v3310_v59  ;;  %v3399_v59 = vld [vmem:[#allocation7 + $0x54c] ss:$24 sps:$4 sm:$0xff]  }
  0xe5   : > { %2176 = vmatpush2.bf16.msra.mxu0 %v3305_v60  ;;  %v3394_v60 = vld [vmem:[#allocation7 + $0x878] ss:$24 sps:$4 sm:$0xff]  }
  0xe6   : > { %2177 = vmatprep.subr.bf16.mxu0 %v3313_v61  ;;  %2217 = vmatpush2.bf16.msra.mxu1 %v3308_v62  ;;  %v3402_v61 = vld [vmem:[#allocation7 + $0x84c] ss:$24 sps:$4 sm:$0xff]   ;;  %v3397_v62 = vld [vmem:[#allocation7 + $0x548] ss:$24 sps:$4 sm:$0xff]  }
  0xe7   : > { %2218 = vmatprep.subr.bf16.mxu1 %v3316_v63  ;;  %v3405_v63 = vld [vmem:[#allocation7 + $0x51c] ss:$24 sps:$4 sm:$0xff]  }
  0xe9   : > { %2178 = vmatpush2.bf16.msra.mxu0 %v3311_v0  ;;  %v3400_v0 = vld [vmem:[#allocation7 + $0x848] ss:$24 sps:$4 sm:$0xff]  }
  0xea   : > { %2179 = vmatprep.subr.bf16.mxu0 %v3319_v1  ;;  %2219 = vmatpush2.bf16.msra.mxu1 %v3314_v2  ;;  %v3408_v1 = vld [vmem:[#allocation7 + $0x81c] ss:$24 sps:$4 sm:$0xff]   ;;  %v3403_v2 = vld [vmem:[#allocation7 + $0x518] ss:$24 sps:$4 sm:$0xff]  }
  0xeb   : > { %2220 = vmatprep.subr.bf16.mxu1 %v3322_v3  ;;  %v3411_v3 = vld [vmem:[#allocation7 + $0x4ec] ss:$24 sps:$4 sm:$0xff]  }
  0xed   : > { %2180 = vmatpush2.bf16.msra.mxu0 %v3317_v4  ;;  %v3406_v4 = vld [vmem:[#allocation7 + $0x818] ss:$24 sps:$4 sm:$0xff]  }
  0xee   : > { %2181 = vmatprep.subr.bf16.mxu0 %v3325_v6  ;;  %2221 = vmatpush2.bf16.msra.mxu1 %v3320_v7  ;;  %v3414_v6 = vld [vmem:[#allocation7 + $0x7ec] ss:$24 sps:$4 sm:$0xff]   ;;  %v3409_v7 = vld [vmem:[#allocation7 + $0x4e8] ss:$24 sps:$4 sm:$0xff]  }
  0xef   : > { %2222 = vmatprep.subr.bf16.mxu1 %v3328_v9  ;;  %v3417_v9 = vld [vmem:[#allocation7 + $0x4bc] ss:$24 sps:$4 sm:$0xff]  }
  0xf1   : > { %2182 = vmatpush2.bf16.msra.mxu0 %v3323_v10  ;;  %v3412_v10 = vld [vmem:[#allocation7 + $0x7e8] ss:$24 sps:$4 sm:$0xff]  }
  0xf2   : > { %2233 = vmatprep.subr.bf16.mxu0 %v3333_v11  ;;  %2223 = vmatpush2.bf16.msra.mxu1 %v3326_v12  ;;  %v3420_v11 = vld [vmem:[#allocation7 + $0x7bc] ss:$24 sps:$4 sm:$0xff]   ;;  %v3415_v12 = vld [vmem:[#allocation7 + $0x4b8] ss:$24 sps:$4 sm:$0xff]  }
  0xf3   : > { %2274 = vmatprep.subr.bf16.mxu1 %v3336_v14  ;;  %v3423_v14 = vld [vmem:[#allocation7 + $0x48c] ss:$24 sps:$4 sm:$0xff]  }
  0xf4   : > { %2184 = vmatmul.mubr.bf16.vlgmr.msra.gmra.mxu0 %v4005_v13 }
  0xf5   : > { %2234 = vmatpush1.bf16.msra.mxu0 %v3331_v15  ;;  %2265 = vmatprep.mubr.bf16.mxu0 %v3985_v52  ;;  %v3418_v15 = vld [vmem:[#allocation7 + $0x7b8] ss:$24 sps:$4 sm:$0xff]  }
  0xf6   : > { %2225 = vmatmul.mubr.bf16.vlgmr.msra.gmra.mxu1 %v3988_v5  ;;  %2235 = vmatprep.subr.bf16.mxu0 %v3339_v16  ;;  %v3426_v16 = vld [vmem:[#allocation7 + $0x78c] ss:$24 sps:$4 sm:$0xff]  }
  0xf7   : > { %2275 = vmatpush1.bf16.msra.mxu1 %v3334_v17  ;;  %2306 = vmatprep.mubr.bf16.mxu1 %v4000_v34  ;;  %v3421_v17 = vld [vmem:[#allocation7 + $0x488] ss:$24 sps:$4 sm:$0xff]  }
  0xf8   : > { %2276 = vmatprep.subr.bf16.mxu1 %v3342_v18  ;;  %v3429_v18 = vld [vmem:[#allocation7 + $0x164] ss:$24 sps:$4 sm:$0xff]  }
  0xf9   : > { %2236 = vmatpush1.bf16.msra.mxu0 %v3337_v19  ;;  %v3424_v19 = vld [vmem:[#allocation7 + $0x788] ss:$24 sps:$4 sm:$0xff]  }
  0xfa   : > { %2237 = vmatprep.subr.bf16.mxu0 %v3345_v20  ;;  %v3432_v20 = vld [vmem:[#allocation7 + $0x464] ss:$24 sps:$4 sm:$0xff]  }
  0xfb   : > { %2277 = vmatpush1.bf16.msra.mxu1 %v3340_v21  ;;  %v3427_v21 = vld [vmem:[#allocation7 + $0x160] ss:$24 sps:$4 sm:$0xff]  }
  0xfc   : > { %2278 = vmatprep.subr.bf16.mxu1 %v3348_v22  ;;  %v3435_v22 = vld [vmem:[#allocation7 + $0x134] ss:$24 sps:$4 sm:$0xff]  }
  0xfd   : > { %2238 = vmatpush1.bf16.msra.mxu0 %v3343_v23  ;;  %v3430_v23 = vld [vmem:[#allocation7 + $0x460] ss:$24 sps:$4 sm:$0xff]  }
  0xfe   : > { %2239 = vmatprep.subr.bf16.mxu0 %v3351_v24  ;;  %v3438_v24 = vld [vmem:[#allocation7 + $0x434] ss:$24 sps:$4 sm:$0xff]  }
  0xff   : > { %2279 = vmatpush1.bf16.msra.mxu1 %v3346_v25  ;;  %v3433_v25 = vld [vmem:[#allocation7 + $0x130] ss:$24 sps:$4 sm:$0xff]  }
 0x100   : > { %2280 = vmatprep.subr.bf16.mxu1 %v3354_v26  ;;  %v3441_v26 = vld [vmem:[#allocation7 + $0x104] ss:$24 sps:$4 sm:$0xff]  }
 0x101   : > { %2240 = vmatpush1.bf16.msra.mxu0 %v3349_v27  ;;  %v3436_v27 = vld [vmem:[#allocation7 + $0x430] ss:$24 sps:$4 sm:$0xff]  }
 0x102   : > { %2241 = vmatprep.subr.bf16.mxu0 %v3357_v28  ;;  %v3444_v28 = vld [vmem:[#allocation7 + $0x404] ss:$24 sps:$4 sm:$0xff]  }
 0x103   : > { %2281 = vmatpush1.bf16.msra.mxu1 %v3352_v29  ;;  %v3439_v29 = vld [vmem:[#allocation7 + $0x100] ss:$24 sps:$4 sm:$0xff]  }
 0x104   : > { %2282 = vmatprep.subr.bf16.mxu1 %v3360_v30  ;;  %v3447_v30 = vld [vmem:[#allocation7 + $0xd4] ss:$24 sps:$4 sm:$0xff]  }
 0x105   : > { %2242 = vmatpush1.bf16.msra.mxu0 %v3355_v31  ;;  %v3442_v31 = vld [vmem:[#allocation7 + $0x400] ss:$24 sps:$4 sm:$0xff]  }
 0x106   : > { %2243 = vmatprep.subr.bf16.mxu0 %v3363_v32  ;;  %v3450_v32 = vld [vmem:[#allocation7 + $0x3d4] ss:$24 sps:$4 sm:$0xff]  }
 0x107   : > { %2283 = vmatpush1.bf16.msra.mxu1 %v3358_v33  ;;  %v3453_v33 = vld [vmem:[#allocation7 + $0xa4] ss:$24 sps:$4 sm:$0xff]  }
 0x108   : > { %2284 = vmatprep.subr.bf16.mxu1 %v3366_v35  ;;  %v3448_v35 = vld [vmem:[#allocation7 + $0x3d0] ss:$24 sps:$4 sm:$0xff]  }
 0x109   : > { %2244 = vmatpush1.bf16.msra.mxu0 %v3361_v36  ;;  %v3456_v36 = vld [vmem:[#allocation7 + $0x3a4] ss:$24 sps:$4 sm:$0xff]  }
 0x10a   : > { %2245 = vmatprep.subr.bf16.mxu0 %v3369_v37  ;;  %v3459_v37 = vld [vmem:[#allocation7 + $0x74] ss:$24 sps:$4 sm:$0xff]  }
 0x10b   : > { %2285 = vmatpush1.bf16.msra.mxu1 %v3364_v38  ;;  %v3454_v38 = vld [vmem:[#allocation7 + $0x3a0] ss:$24 sps:$4 sm:$0xff]  }
 0x10c   : > { %2286 = vmatprep.subr.bf16.mxu1 %v3372_v39  ;;  %v3462_v39 = vld [vmem:[#allocation7 + $0x374] ss:$24 sps:$4 sm:$0xff]  }
 0x10d   : > { %2246 = vmatpush1.bf16.msra.mxu0 %v3367_v40  ;;  %v3457_v40 = vld [vmem:[#allocation7 + $0x70] ss:$24 sps:$4 sm:$0xff]  }
 0x10e   : > { %2247 = vmatprep.subr.bf16.mxu0 %v3375_v41  ;;  %v3465_v41 = vld [vmem:[#allocation7 + $0x44] ss:$24 sps:$4 sm:$0xff]  }
 0x10f   : > { %2287 = vmatpush1.bf16.msra.mxu1 %v3370_v42  ;;  %v3460_v42 = vld [vmem:[#allocation7 + $0x370] ss:$24 sps:$4 sm:$0xff]  }
 0x110   : > { %2288 = vmatprep.subr.bf16.mxu1 %v3378_v43  ;;  %v3468_v43 = vld [vmem:[#allocation7 + $0x344] ss:$24 sps:$4 sm:$0xff]  }
 0x111   : > { %2248 = vmatpush1.bf16.msra.mxu0 %v3373_v44  ;;  %v3463_v44 = vld [vmem:[#allocation7 + $0x40] ss:$24 sps:$4 sm:$0xff]  }
 0x112   : > { %2249 = vmatprep.subr.bf16.mxu0 %v3381_v45  ;;  %v3471_v45 = vld [vmem:[#allocation7 + $0x14] ss:$24 sps:$4 sm:$0xff]  }
 0x113   : > { %2289 = vmatpush1.bf16.msra.mxu1 %v3376_v46  ;;  %v3466_v46 = vld [vmem:[#allocation7 + $0x340] ss:$24 sps:$4 sm:$0xff]  }
 0x114   : > { %2290 = vmatprep.subr.bf16.mxu1 %v3384_v47  ;;  %v3474_v47 = vld [vmem:[#allocation7 + $0x314] ss:$24 sps:$4 sm:$0xff]  }
 0x115   : > { %2250 = vmatpush2.bf16.msra.mxu0 %v3379_v49  ;;  %v3469_v49 = vld [vmem:[#allocation7 + $0x10] ss:$24 sps:$4 sm:$0xff]  }
 0x116   : > { %2251 = vmatprep.subr.bf16.mxu0 %v3387_v50  ;;  %v3477_v50 = vld [vmem:[#allocation7 + $0x2e4] ss:$24 sps:$4 sm:$0xff]  }
 0x117   : > { %2291 = vmatpush2.bf16.msra.mxu1 %v3382_v51  ;;  %v3472_v51 = vld [vmem:[#allocation7 + $0x310] ss:$24 sps:$4 sm:$0xff]  }
 0x118   : > { %2292 = vmatprep.subr.bf16.mxu1 %v3390_v53  ;;  %v3480_v53 = vld [vmem:[#allocation7 + $0x5e4] ss:$24 sps:$4 sm:$0xff]  }
 0x119   : > { %2252 = vmatpush2.bf16.msra.mxu0 %v3385_v54  ;;  %v3475_v54 = vld [vmem:[#allocation7 + $0x2e0] ss:$24 sps:$4 sm:$0xff]  }
 0x11a   : > { %2253 = vmatprep.subr.bf16.mxu0 %v3393_v55  ;;  %v3483_v55 = vld [vmem:[#allocation7 + $0x2b4] ss:$24 sps:$4 sm:$0xff]  }
 0x11b   : > { %2293 = vmatpush2.bf16.msra.mxu1 %v3388_v56  ;;  %v3478_v56 = vld [vmem:[#allocation7 + $0x5e0] ss:$24 sps:$4 sm:$0xff]  }
 0x11c   : > { %2294 = vmatprep.subr.bf16.mxu1 %v3396_v57  ;;  %v3486_v57 = vld [vmem:[#allocation7 + $0x5b4] ss:$24 sps:$4 sm:$0xff]  }
 0x11d   : > { %2254 = vmatpush2.bf16.msra.mxu0 %v3391_v58  ;;  %v3481_v58 = vld [vmem:[#allocation7 + $0x2b0] ss:$24 sps:$4 sm:$0xff]  }
 0x11e   : > { %2255 = vmatprep.subr.bf16.mxu0 %v3399_v59  ;;  %v3489_v59 = vld [vmem:[#allocation7 + $0x284] ss:$24 sps:$4 sm:$0xff]  }
 0x11f   : > { %2295 = vmatpush2.bf16.msra.mxu1 %v3394_v60  ;;  %v3484_v60 = vld [vmem:[#allocation7 + $0x5b0] ss:$24 sps:$4 sm:$0xff]  }
 0x120   : > { %2296 = vmatprep.subr.bf16.mxu1 %v3402_v61  ;;  %v3492_v61 = vld [vmem:[#allocation7 + $0x584] ss:$24 sps:$4 sm:$0xff]  }
 0x121   : > { %2256 = vmatpush2.bf16.msra.mxu0 %v3397_v62  ;;  %v3487_v62 = vld [vmem:[#allocation7 + $0x280] ss:$24 sps:$4 sm:$0xff]  }
 0x122   : > { %2257 = vmatprep.subr.bf16.mxu0 %v3405_v63  ;;  %v3495_v63 = vld [vmem:[#allocation7 + $0x254] ss:$24 sps:$4 sm:$0xff]  }
 0x123   : > { %2297 = vmatpush2.bf16.msra.mxu1 %v3400_v0  ;;  %v3490_v0 = vld [vmem:[#allocation7 + $0x580] ss:$24 sps:$4 sm:$0xff]  }
 0x124   : > { %2298 = vmatprep.subr.bf16.mxu1 %v3408_v1  ;;  %v3498_v1 = vld [vmem:[#allocation7 + $0x554] ss:$24 sps:$4 sm:$0xff]  }
 0x125   : > { %2258 = vmatpush2.bf16.msra.mxu0 %v3403_v2  ;;  %v3493_v2 = vld [vmem:[#allocation7 + $0x250] ss:$24 sps:$4 sm:$0xff]  }
 0x126   : > { %2259 = vmatprep.subr.bf16.mxu0 %v3411_v3  ;;  %v3501_v3 = vld [vmem:[#allocation7 + $0x224] ss:$24 sps:$4 sm:$0xff]  }
 0x127   : > { %2299 = vmatpush2.bf16.msra.mxu1 %v3406_v4  ;;  %v3496_v4 = vld [vmem:[#allocation7 + $0x550] ss:$24 sps:$4 sm:$0xff]  }
 0x128   : > { %2300 = vmatprep.subr.bf16.mxu1 %v3414_v6  ;;  %v3504_v6 = vld [vmem:[#allocation7 + $0x524] ss:$24 sps:$4 sm:$0xff]  }
 0x129   : > { %2260 = vmatpush2.bf16.msra.mxu0 %v3409_v7  ;;  %v3499_v7 = vld [vmem:[#allocation7 + $0x220] ss:$24 sps:$4 sm:$0xff]  }
 0x12a   : > { %2261 = vmatprep.subr.bf16.mxu0 %v3417_v9  ;;  %v3507_v9 = vld [vmem:[#allocation7 + $0x1f4] ss:$24 sps:$4 sm:$0xff]  }
 0x12b   : > { %2301 = vmatpush2.bf16.msra.mxu1 %v3412_v10  ;;  %v3502_v10 = vld [vmem:[#allocation7 + $0x520] ss:$24 sps:$4 sm:$0xff]  }
 0x12c   : > { %2302 = vmatprep.subr.bf16.mxu1 %v3420_v11  ;;  %v3510_v11 = vld [vmem:[#allocation7 + $0x4f4] ss:$24 sps:$4 sm:$0xff]  }
 0x12d   : > { %2262 = vmatpush2.bf16.msra.mxu0 %v3415_v12  ;;  %v3505_v12 = vld [vmem:[#allocation7 + $0x1f0] ss:$24 sps:$4 sm:$0xff]  }
 0x12e   : > { %2263 = vmatprep.subr.bf16.mxu0 %v3423_v14  ;;  %v578_v14 = vlaneseq }
 0x12f   : > { %2303 = vmatpush2.bf16.msra.mxu1 %v3418_v15  ;;  %v3513_v15 = vld [vmem:[#allocation7 + $0x1c4] ss:$24 sps:$4 sm:$0xff]  }
 0x130   : > { %2304 = vmatprep.subr.bf16.mxu1 %v3426_v16  ;;  %v3508_v16 = vld [vmem:[#allocation7 + $0x4f0] ss:$24 sps:$4 sm:$0xff]  }
 0x131   : > { %2264 = vmatpush2.bf16.msra.mxu0 %v3421_v17  ;;  %v3516_v17 = vld [vmem:[#allocation7 + $0x4c4] ss:$24 sps:$4 sm:$0xff]  }
 0x132   : > { %2315 = vmatprep.subr.bf16.mxu0 %v3429_v18  ;;  %v3511_v18 = vld [vmem:[#allocation7 + $0x1c0] ss:$24 sps:$4 sm:$0xff]  }
 0x133   : > { %2305 = vmatpush2.bf16.msra.mxu1 %v3424_v19  ;;  %v4015_v19 = vshrl.u32 %v578_v14, 7 }
 0x134   : > { %2266 = vmatmul.mubr.bf16.vlgmr.msra.gmra.mxu0 %v3990_v8  ;;  %2356 = vmatprep.subr.bf16.mxu1 %v3432_v20  ;;  %v3519_v20 = vld [vmem:[#allocation7 + $0x194] ss:$24 sps:$4 sm:$0xff]  }
 0x135   : > { %2316 = vmatpush1.bf16.msra.mxu0 %v3427_v21  ;;  %2347 = vmatprep.mubr.bf16.mxu0 %v3981_v48  ;;  %v3445_v48 = vld [vmem:[#allocation7 + $0xd0] ss:$24 sps:$4 sm:$0xff]   ;;  %v3514_v21 = vld [vmem:[#allocation7 + $0x4c0] ss:$24 sps:$4 sm:$0xff]  }
 0x136   : > { %2307 = vmatmul.mubr.bf16.vlgmr.msra.gmra.mxu1 %v4005_v13  ;;  %2317 = vmatprep.subr.bf16.mxu0 %v3435_v22  ;;  %v3522_v22 = vld [vmem:[#allocation7 + $0x494] ss:$24 sps:$4 sm:$0xff]  }
 0x137   : > { %2357 = vmatpush1.bf16.msra.mxu1 %v3430_v23  ;;  %2388 = vmatprep.mubr.bf16.mxu1 %v3985_v52  ;;  %v3451_v52 = vld [vmem:[#allocation7 + $0xa0] ss:$24 sps:$4 sm:$0xff]   ;;  %v3517_v23 = vld [vmem:[#allocation7 + $0x190] ss:$24 sps:$4 sm:$0xff]  }
 0x138   : > { %2358 = vmatprep.subr.bf16.mxu1 %v3438_v24  ;;  %v4018_v24 = vsub.s32 0, %v4015_v19 }
 0x139   : > { %2318 = vmatpush1.bf16.msra.mxu0 %v3433_v25  ;;  %v4020_v25 = vld [vmem:[#allocation9] ss:$4 sm:$0x3f] }
 0x13a   : > { %2319 = vmatprep.subr.bf16.mxu0 %v3441_v26  ;;  %v3525_v26 = vld [vmem:[#allocation7 + $0x764] ss:$24 sps:$4 sm:$0xff]  }
 0x13b   : > { %2359 = vmatpush1.bf16.msra.mxu1 %v3436_v27  ;;  %v3520_v27 = vld [vmem:[#allocation7 + $0x490] ss:$24 sps:$4 sm:$0xff]  }
 0x13c   : > { %2360 = vmatprep.subr.bf16.mxu1 %v3444_v28  ;;  %v4023_v28 = vsub.s32 1, %v4015_v19 }
 0x13d   : > { %2320 = vmatpush1.bf16.msra.mxu0 %v3439_v29  ;;  %v581_v29 = vrot.slane %v4020_v25, %v4018_v24 }
 0x13e   : > { %2321 = vmatprep.subr.bf16.mxu0 %v3447_v30  ;;  %v3523_v30 = vld [vmem:[#allocation7 + $0x760] ss:$24 sps:$4 sm:$0xff]  }
 0x13f   : > { %2361 = vmatpush1.bf16.msra.mxu1 %v3442_v31  ;;  %v3528_v31 = vld [vmem:[#allocation7 + $0x734] ss:$24 sps:$4 sm:$0xff]  }
 0x140   : > { %2362 = vmatprep.subr.bf16.mxu1 %v3450_v32  ;;  %v585_v32 = vrot.slane %v4020_v25, %v4023_v28 }
 0x141   : > { %2322 = vmatpush1.bf16.msra.mxu0 %v3445_v48 }
 0x142   : > { %2323 = vmatprep.subr.bf16.mxu0 %v3453_v33 }
 0x143   : > { %2363 = vmatpush1.bf16.msra.mxu1 %v3448_v35  ;;  %v3526_v35 = vld [vmem:[#allocation7 + $0x730] ss:$24 sps:$4 sm:$0xff]  }
 0x144   : > { %2364 = vmatprep.subr.bf16.mxu1 %v3456_v36 }
 0x145   : > { %2324 = vmatpush1.bf16.msra.mxu0 %v3451_v52 }
 0x146   : > { %2325 = vmatprep.subr.bf16.mxu0 %v3459_v37  ;;  %v3531_v37 = vld [vmem:[#allocation7 + $0x704] ss:$24 sps:$4 sm:$0xff]  }
 0x147   : > { %2365 = vmatpush1.bf16.msra.mxu1 %v3454_v38 }
 0x148   : > { %2366 = vmatprep.subr.bf16.mxu1 %v3462_v39 }
 0x149   : > { %2326 = vmatpush1.bf16.msra.mxu0 %v3457_v40 }
 0x14a   : > { %2327 = vmatprep.subr.bf16.mxu0 %v3465_v41 }
 0x14b   : > { %2367 = vmatpush1.bf16.msra.mxu1 %v3460_v42 }
 0x14c   : > { %2368 = vmatprep.subr.bf16.mxu1 %v3468_v43 }
 0x14d   : > { %2328 = vmatpush1.bf16.msra.mxu0 %v3463_v44  ;;  %v3534_v44 = vld [vmem:[#allocation7 + $0x6d4] ss:$24 sps:$4 sm:$0xff]  }
 0x14e   : > { %2329 = vmatprep.subr.bf16.mxu0 %v3471_v45 }
 0x14f   : > { %2369 = vmatpush1.bf16.msra.mxu1 %v3466_v46  ;;  %v3532_v46 = vld [vmem:[#allocation7 + $0x6d0] ss:$24 sps:$4 sm:$0xff]  }
 0x150   : > { %2370 = vmatprep.subr.bf16.mxu1 %v3474_v47  ;;  %v3535_v47 = vld [vmem:[#allocation7 + $0x6a0] ss:$24 sps:$4 sm:$0xff]  }
 0x151   : > { %2330 = vmatpush1.bf16.msra.mxu0 %v3469_v49  ;;  %v3540_v49 = vld [vmem:[#allocation7 + $0x674] ss:$24 sps:$4 sm:$0xff]  }
 0x152   : > { %2331 = vmatprep.subr.bf16.mxu0 %v3477_v50  ;;  %v3538_v50 = vld [vmem:[#allocation7 + $0x670] ss:$24 sps:$4 sm:$0xff]  }
 0x153   : > { %2371 = vmatpush1.bf16.msra.mxu1 %v3472_v51  ;;  %v3543_v51 = vld [vmem:[#allocation7 + $0x644] ss:$24 sps:$4 sm:$0xff]  }
 0x154   : > { %2372 = vmatprep.subr.bf16.mxu1 %v3480_v53  ;;  %v3541_v53 = vld [vmem:[#allocation7 + $0x640] ss:$24 sps:$4 sm:$0xff]  }
 0x155   : > { %2332 = vmatpush2.bf16.msra.mxu0 %v3475_v54  ;;  %v3546_v54 = vld [vmem:[#allocation7 + $0x614] ss:$24 sps:$4 sm:$0xff]  }
 0x156   : > { %2333 = vmatprep.subr.bf16.mxu0 %v3483_v55  ;;  %v3544_v55 = vld [vmem:[#allocation7 + $0x610] ss:$24 sps:$4 sm:$0xff]  }
 0x157   : > { %2373 = vmatpush2.bf16.msra.mxu1 %v3478_v56  ;;  %v3549_v56 = vld [vmem:[#allocation7 + $0x8e4] ss:$24 sps:$4 sm:$0xff]  }
 0x158   : > { %2374 = vmatprep.subr.bf16.mxu1 %v3486_v57  ;;  %v3547_v57 = vld [vmem:[#allocation7 + $0x8e0] ss:$24 sps:$4 sm:$0xff]  }
 0x159   : > { %2334 = vmatpush2.bf16.msra.mxu0 %v3481_v58  ;;  %v3552_v58 = vld [vmem:[#allocation7 + $0x8b4] ss:$24 sps:$4 sm:$0xff]  }
 0x15a   : > { %2335 = vmatprep.subr.bf16.mxu0 %v3489_v59  ;;  %v3550_v59 = vld [vmem:[#allocation7 + $0x8b0] ss:$24 sps:$4 sm:$0xff]  }
 0x15b   : > { %2375 = vmatpush2.bf16.msra.mxu1 %v3484_v60  ;;  %v3555_v60 = vld [vmem:[#allocation7 + $0x884] ss:$24 sps:$4 sm:$0xff]  }
 0x15c   : > { %2376 = vmatprep.subr.bf16.mxu1 %v3492_v61  ;;  %v3553_v61 = vld [vmem:[#allocation7 + $0x880] ss:$24 sps:$4 sm:$0xff]  }
 0x15d   : > { %2336 = vmatpush2.bf16.msra.mxu0 %v3487_v62  ;;  %v3558_v62 = vld [vmem:[#allocation7 + $0x854] ss:$24 sps:$4 sm:$0xff]  }
 0x15e   : > { %2337 = vmatprep.subr.bf16.mxu0 %v3495_v63  ;;  %v3556_v63 = vld [vmem:[#allocation7 + $0x850] ss:$24 sps:$4 sm:$0xff]  }
 0x15f   : > { %2377 = vmatpush2.bf16.msra.mxu1 %v3490_v0  ;;  %v3561_v0 = vld [vmem:[#allocation7 + $0x824] ss:$24 sps:$4 sm:$0xff]  }
 0x160   : > { %2378 = vmatprep.subr.bf16.mxu1 %v3498_v1  ;;  %v3559_v1 = vld [vmem:[#allocation7 + $0x820] ss:$24 sps:$4 sm:$0xff]  }
 0x161   : > { %2338 = vmatpush2.bf16.msra.mxu0 %v3493_v2  ;;  %v3564_v2 = vld [vmem:[#allocation7 + $0x7f4] ss:$24 sps:$4 sm:$0xff]  }
 0x162   : > { %2339 = vmatprep.subr.bf16.mxu0 %v3501_v3  ;;  %v3562_v3 = vld [vmem:[#allocation7 + $0x7f0] ss:$24 sps:$4 sm:$0xff]  }
 0x163   : > { %2379 = vmatpush2.bf16.msra.mxu1 %v3496_v4  ;;  %v3567_v4 = vld [vmem:[#allocation7 + $0x7c4] ss:$24 sps:$4 sm:$0xff]  }
 0x164   : > { %2380 = vmatprep.subr.bf16.mxu1 %v3504_v6  ;;  %v3565_v6 = vld [vmem:[#allocation7 + $0x7c0] ss:$24 sps:$4 sm:$0xff]  }
 0x165   : > { %2340 = vmatpush2.bf16.msra.mxu0 %v3499_v7  ;;  %v3570_v7 = vld [vmem:[#allocation7 + $0x794] ss:$24 sps:$4 sm:$0xff]  }
 0x166   : > { %2341 = vmatprep.subr.bf16.mxu0 %v3507_v9  ;;  %v3568_v9 = vld [vmem:[#allocation7 + $0x790] ss:$24 sps:$4 sm:$0xff]  }
 0x167   : > { %2381 = vmatpush2.bf16.msra.mxu1 %v3502_v10 }
 0x168   : > { %2382 = vmatprep.subr.bf16.mxu1 %v3510_v11 }
 0x169   : > { %2342 = vmatpush2.bf16.msra.mxu0 %v3505_v12 }
 0x16a   : > { %2343 = vmatprep.subr.bf16.mxu0 %v3513_v15 }
 0x16b   : > { %2383 = vmatpush2.bf16.msra.mxu1 %v3508_v16 }
 0x16c   : > { %2384 = vmatprep.subr.bf16.mxu1 %v3516_v17 }
 0x16d   : > { %2344 = vmatpush2.bf16.msra.mxu0 %v3511_v18 }
 0x16e   : > { %2345 = vmatprep.subr.bf16.mxu0 %v3519_v20 }
 0x16f   : > { %2385 = vmatpush2.bf16.msra.mxu1 %v3514_v21 }
 0x170   : > { %2386 = vmatprep.subr.bf16.mxu1 %v3522_v22  ;;  %v4040_v22 = vsub.s32 2, %v4015_v19 }
 0x171   : > { %2346 = vmatpush2.bf16.msra.mxu0 %v3517_v23  ;;  %v4043_v23 = vsub.s32 3, %v4015_v19 }
 0x172   : > { %2397 = vmatprep.subr.bf16.mxu0 %v3525_v26 }
 0x173   : > { %2387 = vmatpush2.bf16.msra.mxu1 %v3520_v27  ;;  %v593_v26 = vrot.slane %v4020_v25, %v4043_v23 }
 0x174   : > { %v2103_v48 = vpop.f32.mrf.mxu0  ;;  %2348 = vmatmul.mubr.bf16.vlgmr.msra.gmra.mxu0 %v3988_v5  ;;  %v3529_v5 = vld [vmem:[#allocation7 + $0x700] ss:$24 sps:$4 sm:$0xff]  }
 0x175   : > { %v2104_v33 = vadd.f32 %v2103_v48, %v581_v29  ;;  %2398 = vmatpush1.bf16.msra.mxu0 %v3523_v30  ;;  %2429 = vmatprep.mubr.bf16.mxu0 %v4000_v34  ;;  %v2144_v52 = vpop.f32.mrf.mxu1 }
 0x176   : > { %v2105_v36 = vpop.f32.mrf.mxu0  ;;  %2389 = vmatmul.mubr.bf16.vlgmr.msra.gmra.mxu1 %v3990_v8  ;;  %2399 = vmatprep.subr.bf16.mxu0 %v3528_v31  ;;  %v3537_v8 = vld [vmem:[#allocation7 + $0x6a4] ss:$24 sps:$4 sm:$0xff]  }
 0x177   : > { %v2106_v38 = vadd.f32 %v2105_v36, %v585_v32  ;;  %v4032_v39 = vadd.f32 %v2144_v52, %v2104_v33  ;;  %v2146_v41 = vpop.f32.mrf.mxu1 }
 0x178   : > { %v2107_v40 = vpop.f32.mrf.mxu0 }
 0x179   : > { %v4034_v42 = vadd.f32 %v2146_v41, %v2106_v38  ;;  %2400 = vmatpush1.bf16.msra.mxu0 %v3526_v35  ;;  %v2148_v45 = vpop.f32.mrf.mxu1 }
 0x17a   : > { %v2108_v43 = vpop.f32.mrf.mxu0  ;;  %2401 = vmatprep.subr.bf16.mxu0 %v3531_v37 }
 0x17b   : > { %v2149_v34 = vpop.f32.mrf.mxu1 }
 0x17d   : > { %2402 = vmatpush1.bf16.msra.mxu0 %v3529_v5 }
 0x17e   : > { %2403 = vmatprep.subr.bf16.mxu0 %v3534_v44 }
 0x181   : > { %2404 = vmatpush1.bf16.msra.mxu0 %v3532_v46 }
 0x182   : > { %2405 = vmatprep.subr.bf16.mxu0 %v3537_v8  ;;  %v2438_v8 = vld [vmem:[%s3974_s6] sm:$0xff] }
 0x185   : > { %2406 = vmatpush1.bf16.msra.mxu0 %v3535_v47  ;;  %v2439_v47 = vld [vmem:[%s3974_s6 + $0x8] sm:$0xff] }
 0x186   : > { %2407 = vmatprep.subr.bf16.mxu0 %v3540_v49  ;;  %v2442_v49 = vunpack.c.h.bf16 %v2438_v8 }
 0x189   : > { %2408 = vmatpush1.bf16.msra.mxu0 %v3538_v50  ;;  %v4052_v50 = vsub.s32 4, %v4015_v19 }
 0x18a   : > { %2409 = vmatprep.subr.bf16.mxu0 %v3543_v51  ;;  %v2441_v51 = vunpack.c.l.bf16 %v2438_v8 }
 0x18d   : > { %2410 = vmatpush1.bf16.msra.mxu0 %v3541_v53  ;;  %v2443_v53 = vunpack.c.l.bf16 %v2439_v47 }
 0x18e   : > { %2411 = vmatprep.subr.bf16.mxu0 %v3546_v54  ;;  %v4055_v54 = vsub.s32 5, %v4015_v19 }
 0x191   : > { %2412 = vmatpush1.bf16.msra.mxu0 %v3544_v55 }
 0x192   : > { %2413 = vmatprep.subr.bf16.mxu0 %v3549_v56  ;;  %v597_v56 = vrot.slane %v4020_v25, %v4052_v50 }
 0x195   : > { %2414 = vmatpush2.bf16.msra.mxu0 %v3547_v57 }
 0x196   : > { %2415 = vmatprep.subr.bf16.mxu0 %v3552_v58 }
 0x199   : > { %2416 = vmatpush2.bf16.msra.mxu0 %v3550_v59  ;;  %v2444_v59 = vunpack.c.h.bf16 %v2439_v47 }
 0x19a   : > { %2417 = vmatprep.subr.bf16.mxu0 %v3555_v60  ;;  %v601_v60 = vrot.slane %v4020_v25, %v4055_v54 }
 0x19d   : > { %2418 = vmatpush2.bf16.msra.mxu0 %v3553_v61 }
 0x19e   : > { %2419 = vmatprep.subr.bf16.mxu0 %v3558_v62 }
 0x1a1   : > { %2420 = vmatpush2.bf16.msra.mxu0 %v3556_v63  ;;  %v2440_v63 = vld [vmem:[%s3974_s6 + $0x10] sm:$0xff] }
 0x1a2   : > { %2421 = vmatprep.subr.bf16.mxu0 %v3561_v0 }
 0x1a5   : > { %2422 = vmatpush2.bf16.msra.mxu0 %v3559_v1 }
 0x1a6   : > { %2423 = vmatprep.subr.bf16.mxu0 %v3564_v2 }
 0x1a9   : > { %2424 = vmatpush2.bf16.msra.mxu0 %v3562_v3 }
 0x1aa   : > { %2425 = vmatprep.subr.bf16.mxu0 %v3567_v4 }
 0x1ad   : > { %2426 = vmatpush2.bf16.msra.mxu0 %v3565_v6 }
 0x1ae   : > { %2427 = vmatprep.subr.bf16.mxu0 %v3570_v7  ;;  %v2445_v7 = vunpack.c.l.bf16 %v2440_v63 }
 0x1b1   : > { %2428 = vmatpush2.bf16.msra.mxu0 %v3568_v9 }
 0x1b4   : > { %v2185_v10 = vpop.f32.mrf.mxu0  ;;  %2430 = vmatmul.mubr.bf16.vlgmr.msra.gmra.mxu0 %v4005_v13  ;;  %v589_v13 = vrot.slane %v4020_v25, %v4040_v22 }
 0x1b5   : > { %v2186_v11 = vadd.f32 %v2185_v10, %v4032_v39  ;;  %v2446_v10 = vunpack.c.h.bf16 %v2440_v63 }
 0x1b6   : > { %v2187_v12 = vpop.f32.mrf.mxu0  ;;  %v2226_v14 = vpop.f32.mrf.mxu1 }
 0x1b7   : > { %v2188_v15 = vadd.f32 %v2187_v12, %v4034_v42  ;;  %v2227_v27 = vadd.f32 %v2226_v14, %v589_v13  ;;  %v4061_v57 = vadd.f32 %v2441_v51, %v2186_v11 }
 0x1b8   : > { %v2189_v16 = vpop.f32.mrf.mxu0  ;;  %v2228_v17 = vpop.f32.mrf.mxu1 }
 0x1b9   : > { %v2229_v29 = vadd.f32 %v2228_v17, %v593_v26  ;;  %v4057_v55 = vadd.f32 %v2442_v49, %v2188_v15  ;;  %v2460_v19 = vmul.f32 %v4061_v57, %v4061_v57 }
 0x1ba   : > { %v2190_v18 = vpop.f32.mrf.mxu0  ;;  %v2230_v20 = vpop.f32.mrf.mxu1 }
 0x1bb   : > { %v2461_v61 = vmul.f32 %v4057_v55, %v4057_v55  ;;  %v2453_v0 = vadd.f32 %v4057_v55, %v4061_v57 }
 0x1bc   : > { %v2231_v21 = vpop.f32.mrf.mxu1 }
 0x1bd   : > { %v2466_v4 = vadd.f32 %v2461_v61, %v2460_v19 }
 0x1f4   : > { %v2267_v30 = vpop.f32.mrf.mxu0 }
 0x1f5   : > { %v2268_v31 = vadd.f32 %v2267_v30, %v2227_v27 }
 0x1f6   : > { %v2269_v32 = vpop.f32.mrf.mxu0  ;;  %v2308_v48 = vpop.f32.mrf.mxu1 }
 0x1f7   : > { %v2270_v33 = vadd.f32 %v2269_v32, %v2229_v29  ;;  %v2309_v35 = vadd.f32 %v2308_v48, %v2268_v31 }
 0x1f8   : > { %v2271_v36 = vpop.f32.mrf.mxu0  ;;  %v2310_v52 = vpop.f32.mrf.mxu1 }
 0x1f9   : > { %v2311_v37 = vadd.f32 %v2310_v52, %v2270_v33  ;;  %v4063_v58 = vadd.f32 %v2443_v53, %v2309_v35 }
 0x1fa   : > { %v2272_v38 = vpop.f32.mrf.mxu0  ;;  %v2312_v39 = vpop.f32.mrf.mxu1 }
 0x1fb   : > { %v2462_v1 = vmul.f32 %v4063_v58, %v4063_v58  ;;  %v2450_v2 = vadd.f32 %v2444_v59, %v2311_v37  ;;  %v2454_v25 = vadd.f32 %v2453_v0, %v4063_v58 }
 0x1fc   : > { %v2313_v40 = vpop.f32.mrf.mxu1 }
 0x1fd   : > { %v2463_v11 = vmul.f32 %v2450_v2, %v2450_v2  ;;  %v2467_v15 = vadd.f32 %v2466_v4, %v2462_v1  ;;  %v2455_v20 = vadd.f32 %v2454_v25, %v2450_v2 }
 0x1ff   : > { %v2468_v29 = vadd.f32 %v2467_v15, %v2463_v11  ;;  %v2573_v15 = vstv %s2566_s25 }
 0x234   : > { %v2349_v41 = vpop.f32.mrf.mxu0 }
 0x235   : > { %v2350_v62 = vadd.f32 %v2349_v41, %v597_v56 }
 0x236   : > { %v2351_v42 = vpop.f32.mrf.mxu0  ;;  %v2390_v5 = vpop.f32.mrf.mxu1 }
 0x237   : > { %v2352_v3 = vadd.f32 %v2351_v42, %v601_v60  ;;  %v2391_v6 = vadd.f32 %v2390_v5, %v2350_v62  ;;  %v574_v42 = vld [vmem:[#allocation9 + $0x1] ss:$4 sm:$0x3f]  ;;  %v576_v5 = vld [vmem:[#allocation9 + $0x2] ss:$4 sm:$0x3f] }
 0x238   : > { %v2353_v43 = vpop.f32.mrf.mxu0  ;;  %v2392_v44 = vpop.f32.mrf.mxu1  ;;  %v2541_v8 = vrot.slane %v576_v5, %v4040_v22  ;;  %v2508_v47 = vrot.slane %v574_v42, %v4043_v23  ;;  %v2545_v49 = vrot.slane %v576_v5, %v4043_v23  ;;  %v2512_v60 = vrot.slane %v574_v42, %v4052_v50 }
 0x239   : > { %v2393_v12 = vadd.f32 %v2392_v44, %v2352_v3  ;;  %v2496_v43 = vrot.slane %v574_v42, %v4018_v24  ;;  %v2533_v44 = vrot.slane %v576_v5, %v4018_v24  ;;  %v2549_v23 = vrot.slane %v576_v5, %v4052_v50 }
 0x23a   : > { %v2354_v45 = vpop.f32.mrf.mxu0  ;;  %v2394_v34 = vpop.f32.mrf.mxu1 }
 0x23b   : > { %v2500_v45 = vrot.slane %v574_v42, %v4023_v28  ;;  %v2537_v34 = vrot.slane %v576_v5, %v4023_v28  ;;  %v2516_v28 = vrot.slane %v574_v42, %v4055_v54 }
 0x23c   : > { %v2395_v46 = vpop.f32.mrf.mxu1 }
 0x23d   : > { %v2504_v46 = vrot.slane %v574_v42, %v4040_v22 }
 0x274   : > { %v2431_v9 = vpop.f32.mrf.mxu0 }
 0x275   : > { %v2432_v14 = vadd.f32 %v2431_v9, %v2391_v6 }
 0x276   : > { %v2433_v16 = vpop.f32.mrf.mxu0 }
 0x277   : > { %v2451_v17 = vadd.f32 %v2445_v7, %v2432_v14  ;;  %v2434_v18 = vadd.f32 %v2433_v16, %v2393_v12 }
 0x278   : > { %v2435_v21 = vpop.f32.mrf.mxu0 }
 0x279   : > { %v2452_v13 = vadd.f32 %v2446_v10, %v2434_v18  ;;  %v2456_v26 = vadd.f32 %v2455_v20, %v2451_v17  ;;  %v2464_v27 = vmul.f32 %v2451_v17, %v2451_v17 }
 0x27a   : > { %v2436_v30 = vpop.f32.mrf.mxu0 }
 0x27b   : > { %v2457_v31 = vadd.f32 %v2456_v26, %v2452_v13  ;;  %v2465_v32 = vmul.f32 %v2452_v13, %v2452_v13  ;;  %v2469_v48 = vadd.f32 %v2468_v29, %v2464_v27 }
 0x27d   : > { %2458 = vadd.xlane.f32.xlu0 %v2457_v31  ;;  %v2470_v33 = vadd.f32 %v2469_v48, %v2465_v32 }
 0x281   : > { %2471 = vadd.xlane.f32.xlu0 %v2470_v33 }
 0x306   : > { %v2459_v35 = vpop.xlane.xlu0 %2458 }
 0x307   : > { %v2473_v36 = vmul.f32 0.0013020834, %v2459_v35 }
 0x309   : > { %v2475_v37 = vmul.f32 %v2473_v36, %v2473_v36  ;;  %v2478_v51 = vsub.f32 %v4061_v57, %v2473_v36  ;;  %v2479_v53 = vsub.f32 %v4057_v55, %v2473_v36  ;;  %v2480_v56 = vsub.f32 %v4063_v58, %v2473_v36 }
 0x30a   : > { %v2472_v52 = vpop.xlane.xlu0 %2471  ;;  %v2481_v24 = vsub.f32 %v2450_v2, %v2473_v36  ;;  %v2482_v61 = vsub.f32 %v2451_v17, %v2473_v36  ;;  %v2483_v62 = vsub.f32 %v2452_v13, %v2473_v36  ;;  %v2553_v57 = vrot.slane %v576_v5, %v4055_v54 }
 0x30b   : > { %v2474_v38 = vmul.f32 0.0013020834, %v2472_v52 }
 0x30d   : > { %v2476_v39 = vsub.f32 %v2474_v38, %v2475_v37 }
 0x30f   : > { %v2477_v40 = vmax.f32 %v2476_v39, 0.0 }
 0x311   : > { %v2484_v41 = vadd.f32 1e-12, %v2477_v40 }
 0x313   : > { %3571 = vrsqrt.f32 %v2484_v41 }
 0x320   : > { %v3572_v59 = vpop.eup %3571 }
 0x321   : > { %v2486_v22 = vmul.f32 %v3572_v59, %v2478_v51  ;;  %v2487_v19 = vmul.f32 %v3572_v59, %v2479_v53  ;;  %v2488_v63 = vmul.f32 %v3572_v59, %v2480_v56  ;;  %v2489_v0 = vmul.f32 %v3572_v59, %v2481_v24 }
 0x322   : > { %v2490_v1 = vmul.f32 %v3572_v59, %v2482_v61  ;;  %v2491_v55 = vmul.f32 %v3572_v59, %v2483_v62 }
 0x323   : > { %v2523_v3 = vmul.f32 %v2496_v43, %v2486_v22  ;;  %v2524_v58 = vmul.f32 %v2500_v45, %v2487_v19  ;;  %v2525_v2 = vmul.f32 %v2504_v46, %v2488_v63  ;;  %v2526_v4 = vmul.f32 %v2508_v47, %v2489_v0 }
 0x324   : > { %v2527_v6 = vmul.f32 %v2512_v60, %v2490_v1  ;;  %v2528_v7 = vmul.f32 %v2516_v28, %v2491_v55 }
 0x325   : > { %v2560_v25 = vadd.f32 %v2533_v44, %v2523_v3  ;;  %v2561_v9 = vadd.f32 %v2537_v34, %v2524_v58  ;;  %v2562_v10 = vadd.f32 %v2541_v8, %v2525_v2  ;;  %v2563_v11 = vadd.f32 %v2545_v49, %v2526_v4 }
 0x326   : > { %v2564_v12 = vadd.f32 %v2549_v23, %v2527_v6  ;;  %v2565_v14 = vadd.f32 %v2553_v57, %v2528_v7 }
 0x327   : > { %v2567_v50 = vand.u32 2147483647, %v2560_v25  ;;  %v2568_v16 = vand.u32 2147483647, %v2561_v9  ;;  %v2569_v54 = vand.u32 2147483647, %v2562_v10 }
 0x328   : > { %v2570_v17 = vand.u32 2147483647, %v2563_v11  ;;  %v2571_v18 = vand.u32 2147483647, %v2564_v12  ;;  %v2572_v20 = vand.u32 2147483647, %v2565_v14 }
 0x329   : > { %vm2574_vm0 = vcmp.gt.f32.partialorder %v2567_v50, %v2573_v15  ;;  %vm2575_vm1 = vcmp.gt.f32.partialorder %v2568_v16, %v2573_v15  ;;  %vm2576_vm2 = vcmp.gt.f32.partialorder %v2569_v54, %v2573_v15 }
 0x32a   : > { %vm2577_vm3 = vcmp.gt.f32.partialorder %v2570_v17, %v2573_v15  ;;  %vm2578_vm4 = vcmp.gt.f32.partialorder %v2571_v18, %v2573_v15  ;;  %vm2579_vm5 = vcmp.gt.f32.partialorder %v2572_v20, %v2573_v15  ;;  %v2580_v21 = vsel %vm2574_vm0, %v2560_v25, 0.0 }
 0x32b   : > { %v2581_v13 = vsel %vm2575_vm1, %v2561_v9, 0.0  ;;  %v2582_v26 = vsel %vm2576_vm2, %v2562_v10, 0.0  ;;  %v2583_v27 = vsel %vm2577_vm3, %v2563_v11, 0.0  ;;  %v2584_v29 = vsel %vm2578_vm4, %v2564_v12, 0.0 }
 0x32c   : > { %v2585_v30 = vsel %vm2579_vm5, %v2565_v14, 0.0  ;;  %v3050_v31 = vpack.c.bf16 %v2581_v13, %v2580_v21  ;;  %v3051_v32 = vpack.c.bf16 %v2583_v27, %v2582_v26 }
 0x32d   : > { %v3052_v48 = vpack.c.bf16 %v2585_v30, %v2584_v29 }
 0x32e   : > { %2610 = vst [vmem:[%s280_s7] sm:$0xff] %v3050_v31  ;;  %2611 = vst [vmem:[%s280_s7 + $0x8] sm:$0xff] %v3051_v32 }
 0x32f   : > { %2612 = vst [vmem:[%s280_s7 + $0x10] sm:$0xff] %v3052_v48 }
 0x330   : > { %3694 = shalt.err (!%p3691_p5)
}
 0x331   : > { %s3695_s10 = scalar_lea.hbm %s4097_s0, 384  ;;  %s3699_s11 = scalar_lea.hbm %s4145_s5, 768 }
 0x332   : > { %p3696_p4 = scmp.ne.s32.totalorder %s4097_s0, %s3695_s10  ;;  %p3700_p0 = scmp.lt.s32.totalorder %s4097_s0, %s4145_s5 }
 0x333   : > { %p3701_p11 = scmp.lt.s32.totalorder %s3699_s11, %s3695_s10 }
 0x334   : > { %p3697_p8 = pnand %p3696_p4, %p4163_p2 }
 0x335   : > { %p3702_p10 = por %p3701_p11, %p3700_p0 }
 0x336   : > { %p3698_p3 = pneg %p3697_p8 }
 0x338   : > { %p3703_p1 = pnand %p3702_p10, %p3698_p3 }
 0x33a   : > { %3706 = shalt.err (!%p3703_p1)
}
 0x33b   : > { %3071 = dma.vmem_to_hbm [thread:$0]  (%p4163_p2), %s4099_s8, 384, %s4097_s0, %s2614_s14  }
 0x33c PF: > { %s2640_s25 = sand.u32 1, %s3741_s20   ;;  %p4164_p6 = scmp.ne.s32.totalorder %s4152_s26, 0 }
 0x33d   : > { %p4165_p12 = scmp.ge.s32.totalorder %s3753_s23, 2  ;;  %s2641_s17 = scalar_lea.sflag [#allocation6], %s2640_s25 }
 0x33f   : > { %p3088_p7 = pnand %p4165_p12, %p4164_p6 }
 0x341   : > { %p3089_p9 = pneg %p3088_p7 }
 0x343   : > { %3736 = dma.done.wait (%p3089_p9), %s2641_s17, 384  }
 0x344   : > { %3738 = vsyncadd (%p3089_p9), %s2641_s17, 4294966912  ;;  %p23_p13 = scmp.ge.s32.totalorder %s3867_s16, 4   ;;  %s4166_s20 = smov %s3745_s21 }
 0x345   : > { %s4167_s21 = smov %s3749_s22  ;;  %s4168_s22 = smov %s3883_s24 }
 0x346   : > { %s4169_s23 = smov %s3867_s16  ;;  %25 = sbr.rel (!%p23_p13) target bundleno = 10 (0xa), region = 104 }
 0x34b   :  { %2646 = vsyncpa [#allocation5], 1 }
 0x34c   :  { %2648 = vsyncpa [#allocation5 + $0x1], 1 }
 0x34d   :  { %2649 = vsyncpa [#allocation8], 1 }
 0x34e   :  { %2650 = vsyncpa [#allocation11], 1 }
 0x34f   :  { %2652 = vsyncpa [#allocation11 + $0x1], 1 }
 0x350   :  { %2653 = vsyncpa [#allocation6], 1 }
 0x351   :  { %2655 = vsyncpa [#allocation6 + $0x1], 1 }

</bundles_post_ra>
